<compile_context>
chip_gen: v5e
topology: v5e:2x2
jax: 0.10.0
libtpu: 0.0.40
codegen_flags: <defaults>
</compile_context>

<pallas_src>
import functools

import jax
import jax.numpy as jnp
from jax.experimental import pallas as pl
from jax.experimental.pallas import tpu as pltpu

D_IN, H1, H2, D_OUT = 784, 300, 100, 10
# Lane-aligned (multiple-of-128) padded feature dims.
H1P, H2P, D_OUTP = 384, 128, 128


def _mlp_kernel(x_ref, w1_ref, b1_ref, w2_ref, b2_ref, w3_ref, b3_ref, o_ref):
    # Layer 1: bf16 MXU matmul with f32 accumulation; bias + sigmoid in f32.
    h = jnp.dot(x_ref[...], w1_ref[...], preferred_element_type=jnp.float32)
    h = jax.nn.sigmoid(h + b1_ref[...])
    # Layer 2
    h = jnp.dot(h.astype(jnp.bfloat16), w2_ref[...],
                preferred_element_type=jnp.float32)
    h = jax.nn.sigmoid(h + b2_ref[...])
    # Layer 3 (lane-dense padded output block; extra columns sliced in wrapper)
    h = jnp.dot(h.astype(jnp.bfloat16), w3_ref[...],
                preferred_element_type=jnp.float32)
    o_ref[...] = jax.nn.sigmoid(h + b3_ref[...]).astype(o_ref.dtype)


def _round_up(x, m):
    return (x + m - 1) // m * m


def _pad2(a, rows, cols):
    r, c = a.shape
    return jnp.pad(a, ((0, rows - r), (0, cols - c)))


def _prepare_params(params):
    """Zero-pad to lane-aligned shapes; weights -> bf16, biases stay f32."""
    w1 = _pad2(params["w1"], D_IN, H1P).astype(jnp.bfloat16)
    w2 = _pad2(params["w2"], H1P, H2P).astype(jnp.bfloat16)
    w3 = _pad2(params["w3"], H2P, D_OUTP).astype(jnp.bfloat16)
    b1 = _pad2(params["b1"], 1, H1P)
    b2 = _pad2(params["b2"], 1, H2P)
    b3 = _pad2(params["b3"], 1, D_OUTP)
    return w1, b1, w2, b2, w3, b3


@functools.partial(jax.jit, static_argnames=("block_b",))
def mlp_forward(x, params, *, block_b=256):
    """x: (B, 784) float32.  params: dict of w1,b1,w2,b2,w3,b3 (f32, unpadded)."""
    B = x.shape[0]
    w1, b1, w2, b2, w3, b3 = _prepare_params(params)

    # Batch tile: 128-aligned-friendly, but never larger than the (8-padded) batch.
    tb = min(block_b, _round_up(B, 8))
    b_pad = _round_up(B, tb)

    xb = x.astype(jnp.bfloat16)
    if b_pad != B:
        xb = jnp.pad(xb, ((0, b_pad - B), (0, 0)))

    grid = (b_pad // tb,)
    const = lambda shape: pl.BlockSpec(shape, lambda i: (0, 0))

    out = pl.pallas_call(
        _mlp_kernel,
        out_shape=jax.ShapeDtypeStruct((b_pad, D_OUTP), jnp.float32),
        grid=grid,
        in_specs=[
            pl.BlockSpec((tb, D_IN), lambda i: (i, 0)),   # x: batch-tiled
            const((D_IN, H1P)), const((1, H1P)),          # weights/biases:
            const((H1P, H2P)), const((1, H2P)),           # fetched once,
            const((H2P, D_OUTP)), const((1, D_OUTP)),     # VMEM-resident
        ],
        out_specs=pl.BlockSpec((tb, D_OUTP), lambda i: (i, 0)),
        compiler_params=pltpu.CompilerParams(
            dimension_semantics=("parallel",),
            vmem_limit_bytes=16 << 20,
        ),
    )(xb, w1, b1, w2, b2, w3, b3)

    return out[:B, :D_OUT]


def init_params(key):
    """Deterministic init mimicking nn.Linear default (uniform(-1/sqrt(in), 1/sqrt(in)))."""
    ks = jax.random.split(key, 6)

    def lin(kw, kb, fan_in, fan_out):
        bound = 1.0 / jnp.sqrt(jnp.float32(fan_in))
        w = jax.random.uniform(kw, (fan_in, fan_out), jnp.float32, -bound, bound)
        b = jax.random.uniform(kb, (1, fan_out), jnp.float32, -bound, bound)
        return w, b

    w1, b1 = lin(ks[0], ks[1], D_IN, H1)
    w2, b2 = lin(ks[2], ks[3], H1, H2)
    w3, b3 = lin(ks[4], ks[5], H2, D_OUT)
    return dict(w1=w1, b1=b1, w2=w2, b2=b2, w3=w3, b3=b3)


def mlp_reference(x, p):
    """Same math path as the kernel: bf16 operands, f32 accumulate/bias/sigmoid."""
    w1 = p["w1"].astype(jnp.bfloat16)
    w2 = p["w2"].astype(jnp.bfloat16)
    w3 = p["w3"].astype(jnp.bfloat16)
    h = jax.nn.sigmoid(
        jnp.dot(x.astype(jnp.bfloat16), w1, preferred_element_type=jnp.float32)
        + p["b1"])
    h = jax.nn.sigmoid(
        jnp.dot(h.astype(jnp.bfloat16), w2, preferred_element_type=jnp.float32)
        + p["b2"])
    h = jax.nn.sigmoid(
        jnp.dot(h.astype(jnp.bfloat16), w3, preferred_element_type=jnp.float32)
        + p["b3"])
    return h


def mlp_reference_f32(x, p):
    h = jax.nn.sigmoid(x @ p["w1"] + p["b1"])
    h = jax.nn.sigmoid(h @ p["w2"] + p["b2"])
    return jax.nn.sigmoid(h @ p["w3"] + p["b3"])


if __name__ == "__main__":
    key = jax.random.PRNGKey(0)
    kp, kx, kx2 = jax.random.split(key, 3)
    params = init_params(kp)

    # Small batch (single grid step).
    B = 8
    x = jax.random.normal(kx, (B, D_IN), jnp.float32)
    out = jax.block_until_ready(mlp_forward(x, params))
    assert out.shape == (B, D_OUT), out.shape
    assert jnp.allclose(out, mlp_reference(x, params), atol=2e-3, rtol=2e-3), \
        "mismatch vs bf16-path reference"
    assert jnp.allclose(out, mlp_reference_f32(x, params), atol=3e-2), \
        "mismatch vs f32 reference"

    # Larger batch, not a multiple of the tile: exercises grid>1 + batch padding.
    B2 = 300
    x2 = jax.random.normal(kx2, (B2, D_IN), jnp.float32)
    out2 = jax.block_until_ready(mlp_forward(x2, params, block_b=128))
    assert out2.shape == (B2, D_OUT), out2.shape
    assert jnp.allclose(out2, mlp_reference(x2, params), atol=2e-3, rtol=2e-3), \
        "mismatch vs bf16-path reference (tiled batch)"

    print("KERNEL_OK")
</pallas_src>

<mosaic_0001>
module attributes {stable_mosaic.version = 11 : i64} {
  func.func @_mlp_kernel(%arg0: i32, %arg1: memref<8x784xbf16, #tpu.memory_space<vmem>>, %arg2: memref<784x384xbf16, #tpu.memory_space<vmem>>, %arg3: memref<1x384xf32, #tpu.memory_space<vmem>>, %arg4: memref<384x128xbf16, #tpu.memory_space<vmem>>, %arg5: memref<1x128xf32, #tpu.memory_space<vmem>>, %arg6: memref<128x128xbf16, #tpu.memory_space<vmem>>, %arg7: memref<1x128xf32, #tpu.memory_space<vmem>>, %arg8: memref<8x128xf32, #tpu.memory_space<vmem>>) attributes {dimension_semantics = [#tpu.dimension_semantics<parallel>], iteration_bounds = array<i64: 1>, scalar_prefetch = 0 : i64, scratch_operands = 0 : i64, tpu.core_type = #tpu.core_type<tc>, window_params = [{transform_indices = @transform_0, window_bounds = array<i64: 8, 784>}, {pipeline_mode = #tpu.pipeline_mode<synchronous>, transform_indices = @transform_1, window_bounds = array<i64: 784, 384>}, {pipeline_mode = #tpu.pipeline_mode<synchronous>, transform_indices = @transform_2, window_bounds = array<i64: 1, 384>}, {pipeline_mode = #tpu.pipeline_mode<synchronous>, transform_indices = @transform_3, window_bounds = array<i64: 384, 128>}, {pipeline_mode = #tpu.pipeline_mode<synchronous>, transform_indices = @transform_4, window_bounds = array<i64: 1, 128>}, {pipeline_mode = #tpu.pipeline_mode<synchronous>, transform_indices = @transform_5, window_bounds = array<i64: 128, 128>}, {pipeline_mode = #tpu.pipeline_mode<synchronous>, transform_indices = @transform_6, window_bounds = array<i64: 1, 128>}, {transform_indices = @transform_7, window_bounds = array<i64: 8, 128>}]} {
    %c0 = arith.constant 0 : index
    %c0_0 = arith.constant 0 : index
    %0 = vector.load %arg1[%c0, %c0_0] : memref<8x784xbf16, #tpu.memory_space<vmem>>, vector<8x784xbf16>
    %c0_1 = arith.constant 0 : index
    %c0_2 = arith.constant 0 : index
    %1 = vector.load %arg2[%c0_1, %c0_2] : memref<784x384xbf16, #tpu.memory_space<vmem>>, vector<784x384xbf16>
    %cst = arith.constant dense<0.000000e+00> : vector<8x384xf32>
    %2 = tpu.matmul %0, %1, %cst {dimension_numbers = #tpu.dot_dimension_numbers<[1], [0], [0], [1], [0, 0, 1, 1], [], []>} : vector<8x784xbf16>, vector<784x384xbf16>, vector<8x384xf32> -> vector<8x384xf32>
    %c0_3 = arith.constant 0 : index
    %c0_4 = arith.constant 0 : index
    %3 = vector.load %arg3[%c0_3, %c0_4] : memref<1x384xf32, #tpu.memory_space<vmem>>, vector<1x384xf32>
    %4 = vector.broadcast %3 : vector<1x384xf32> to vector<8x384xf32>
    %5 = arith.addf %2, %4 : vector<8x384xf32>
    %6 = arith.negf %5 : vector<8x384xf32>
    %7 = math.exp %6 : vector<8x384xf32>
    %cst_5 = arith.constant 1.000000e+00 : f32
    %8 = vector.broadcast %cst_5 : f32 to vector<8x384xf32>
    %9 = arith.addf %8, %7 : vector<8x384xf32>
    %10 = arith.divf %8, %9 : vector<8x384xf32>
    %11 = arith.truncf %10 : vector<8x384xf32> to vector<8x384xbf16>
    %c0_6 = arith.constant 0 : index
    %c0_7 = arith.constant 0 : index
    %12 = vector.load %arg4[%c0_6, %c0_7] : memref<384x128xbf16, #tpu.memory_space<vmem>>, vector<384x128xbf16>
    %cst_8 = arith.constant dense<0.000000e+00> : vector<8x128xf32>
    %13 = tpu.matmul %11, %12, %cst_8 {dimension_numbers = #tpu.dot_dimension_numbers<[1], [0], [0], [1], [0, 0, 1, 1], [], []>} : vector<8x384xbf16>, vector<384x128xbf16>, vector<8x128xf32> -> vector<8x128xf32>
    %c0_9 = arith.constant 0 : index
    %c0_10 = arith.constant 0 : index
    %14 = vector.load %arg5[%c0_9, %c0_10] : memref<1x128xf32, #tpu.memory_space<vmem>>, vector<1x128xf32>
    %15 = vector.broadcast %14 : vector<1x128xf32> to vector<8x128xf32>
    %16 = arith.addf %13, %15 : vector<8x128xf32>
    %17 = arith.negf %16 : vector<8x128xf32>
    %18 = math.exp %17 : vector<8x128xf32>
    %cst_11 = arith.constant 1.000000e+00 : f32
    %19 = vector.broadcast %cst_11 : f32 to vector<8x128xf32>
    %20 = arith.addf %19, %18 : vector<8x128xf32>
    %21 = arith.divf %19, %20 : vector<8x128xf32>
    %22 = arith.truncf %21 : vector<8x128xf32> to vector<8x128xbf16>
    %c0_12 = arith.constant 0 : index
    %c0_13 = arith.constant 0 : index
    %23 = vector.load %arg6[%c0_12, %c0_13] : memref<128x128xbf16, #tpu.memory_space<vmem>>, vector<128x128xbf16>
    %cst_14 = arith.constant dense<0.000000e+00> : vector<8x128xf32>
    %24 = tpu.matmul %22, %23, %cst_14 {dimension_numbers = #tpu.dot_dimension_numbers<[1], [0], [0], [1], [0, 0, 1, 1], [], []>} : vector<8x128xbf16>, vector<128x128xbf16>, vector<8x128xf32> -> vector<8x128xf32>
    %c0_15 = arith.constant 0 : index
    %c0_16 = arith.constant 0 : index
    %25 = vector.load %arg7[%c0_15, %c0_16] : memref<1x128xf32, #tpu.memory_space<vmem>>, vector<1x128xf32>
    %26 = vector.broadcast %25 : vector<1x128xf32> to vector<8x128xf32>
    %27 = arith.addf %24, %26 : vector<8x128xf32>
    %28 = arith.negf %27 : vector<8x128xf32>
    %29 = math.exp %28 : vector<8x128xf32>
    %cst_17 = arith.constant 1.000000e+00 : f32
    %30 = vector.broadcast %cst_17 : f32 to vector<8x128xf32>
    %31 = arith.addf %30, %29 : vector<8x128xf32>
    %32 = arith.divf %30, %31 : vector<8x128xf32>
    %c0_18 = arith.constant 0 : index
    %c0_19 = arith.constant 0 : index
    %33 = vector.load %arg8[%c0_18, %c0_19] : memref<8x128xf32, #tpu.memory_space<vmem>>, vector<8x128xf32>
    tpu.vector_store %arg8[%c0_18, %c0_19], %32 {strides = array<i32>} : memref<8x128xf32, #tpu.memory_space<vmem>>, vector<8x128xf32>,
    return
  }
  func.func @transform_0(%arg0: i32) -> (i32, i32) {
    %c0_i32 = arith.constant 0 : i32
    %c0_i32_0 = arith.constant 0 : i32
    return %arg0, %c0_i32 : i32, i32
  }
  func.func @transform_1(%arg0: i32) -> (i32, i32) {
    %c0_i32 = arith.constant 0 : i32
    %c0_i32_0 = arith.constant 0 : i32
    %c0_i32_1 = arith.constant 0 : i32
    return %c0_i32, %c0_i32_0 : i32, i32
  }
  func.func @transform_2(%arg0: i32) -> (i32, i32) {
    %c0_i32 = arith.constant 0 : i32
    %c0_i32_0 = arith.constant 0 : i32
    %c0_i32_1 = arith.constant 0 : i32
    return %c0_i32, %c0_i32_0 : i32, i32
  }
  func.func @transform_3(%arg0: i32) -> (i32, i32) {
    %c0_i32 = arith.constant 0 : i32
    %c0_i32_0 = arith.constant 0 : i32
    %c0_i32_1 = arith.constant 0 : i32
    return %c0_i32, %c0_i32_0 : i32, i32
  }
  func.func @transform_4(%arg0: i32) -> (i32, i32) {
    %c0_i32 = arith.constant 0 : i32
    %c0_i32_0 = arith.constant 0 : i32
    %c0_i32_1 = arith.constant 0 : i32
    return %c0_i32, %c0_i32_0 : i32, i32
  }
  func.func @transform_5(%arg0: i32) -> (i32, i32) {
    %c0_i32 = arith.constant 0 : i32
    %c0_i32_0 = arith.constant 0 : i32
    %c0_i32_1 = arith.constant 0 : i32
    return %c0_i32, %c0_i32_0 : i32, i32
  }
  func.func @transform_6(%arg0: i32) -> (i32, i32) {
    %c0_i32 = arith.constant 0 : i32
    %c0_i32_0 = arith.constant 0 : i32
    %c0_i32_1 = arith.constant 0 : i32
    return %c0_i32, %c0_i32_0 : i32, i32
  }
  func.func @transform_7(%arg0: i32) -> (i32, i32) {
    %c0_i32 = arith.constant 0 : i32
    %c0_i32_0 = arith.constant 0 : i32
    return %arg0, %c0_i32 : i32, i32
  }
}

</mosaic_0001>

<bundles_post_ra>
// kernel: mlp_forward.1
= control target key start
LH: loop header
LB: loop body
LE: loop exit
PB: predicated region body
PF: predicated region fallthrough
CT: control target
= control target key end

     0   :  { %vm1044_vm0 = vcmask 130048   ;;  %s3791_s0 = inlined_call_operand.vmem [shape: bf16[8,784], index: 0, kind: input, shape index: {}]   ;;  %s3792_s1 = inlined_call_operand.vmem [shape: bf16[784,384], index: 1, kind: input, shape index: {}]   ;;  %s3793_s2 = inlined_call_operand.vmem [shape: f32[1,384], index: 2, kind: input, shape index: {}]   ;;  %s3794_s3 = inlined_call_operand.vmem [shape: bf16[384,128], index: 3, kind: input, shape index: {}]   ;;  %s3795_s4 = inlined_call_operand.vmem [shape: f32[1,128], index: 4, kind: input, shape index: {}]   ;;  %s3796_s5 = inlined_call_operand.vmem [shape: bf16[128,128], index: 5, kind: input, shape index: {}]   ;;  %s3797_s6 = inlined_call_operand.vmem [shape: f32[1,128], index: 6, kind: input, shape index: {}]   ;;  %s3798_s7 = inlined_call_operand.hbm [shape: f32[8,128], index: 7, kind: output, shape index: {}]  }
   0x1   :  { %v1839_v0 = vld [vmem:[%s3792_s1 + $0xa8] sm:$0xf]  ;;  %v2499_v1 = vld [vmem:[%s3792_s1 + $0xb0] sm:$0xf0]  ;;  %v1827_v9 = vld [vmem:[%s3792_s1 + $0x90] sm:$0xf] }
   0x2   :  { %v1935_v2 = vld [vmem:[%s3792_s1 + $0x168] sm:$0xf]  ;;  %v1840_v3 = vor.u32 %v2499_v1, %v1839_v0  ;;  %v2523_v4 = vld [vmem:[%s3792_s1 + $0x170] sm:$0xf0]  ;;  %v2496_v10 = vld [vmem:[%s3792_s1 + $0x98] sm:$0xf0] }
   0x3   :  { %v2127_v5 = vld [vmem:[%s3792_s1 + $0x2e8] sm:$0xf]  ;;  %v2571_v6 = vld [vmem:[%s3792_s1 + $0x2f0] sm:$0xf0]  ;;  %v1936_v7 = vor.u32 %v2523_v4, %v1935_v2  ;;  %v1923_v11 = vld [vmem:[%s3792_s1 + $0x150] sm:$0xf]  ;;  %v1828_v12 = vor.u32 %v2496_v10, %v1827_v9 }
   0x4   :  { %v2128_v8 = vor.u32 %v2571_v6, %v2127_v5  ;;  %1048 = vmatpush.bf16.msra.mxu0 %v1840_v3  ;;  %v2520_v13 = vld [vmem:[%s3792_s1 + $0x158] sm:$0xf0]  ;;  %v2115_v14 = vld [vmem:[%s3792_s1 + $0x2d0] sm:$0xf]  ;;  %v2031_v18 = vld [vmem:[%s3792_s1 + $0x228] sm:$0xf] }
   0x5   :  { %v2568_v15 = vld [vmem:[%s3792_s1 + $0x2d8] sm:$0xf0]  ;;  %1061 = vmatpush.bf16.msra.mxu1 %v1936_v7  ;;  %v1924_v16 = vor.u32 %v2520_v13, %v1923_v11  ;;  %v2547_v19 = vld [vmem:[%s3792_s1 + $0x230] sm:$0xf0]  ;;  %v1815_v20 = vld [vmem:[%s3792_s1 + $0x78] sm:$0xf] }
   0x6   :  { %1087 = vmatpush.bf16.msra.mxu3 %v2128_v8  ;;  %v2116_v17 = vor.u32 %v2568_v15, %v2115_v14  ;;  %v2032_v21 = vor.u32 %v2547_v19, %v2031_v18  ;;  %v2493_v22 = vld [vmem:[%s3792_s1 + $0x80] sm:$0xf0]  ;;  %v1911_v23 = vld [vmem:[%s3792_s1 + $0x138] sm:$0xf]  ;;  %v2019_v27 = vld [vmem:[%s3792_s1 + $0x210] sm:$0xf] }
   0x7   :  { %v2517_v24 = vld [vmem:[%s3792_s1 + $0x140] sm:$0xf0]  ;;  %v2103_v25 = vld [vmem:[%s3792_s1 + $0x2b8] sm:$0xf]  ;;  %v1816_v28 = vor.u32 %v2493_v22, %v1815_v20  ;;  %v2544_v29 = vld [vmem:[%s3792_s1 + $0x218] sm:$0xf0] }
   0x8   :  { %v2565_v26 = vld [vmem:[%s3792_s1 + $0x2c0] sm:$0xf0]  ;;  %1049 = vmatpush.bf16.msra.mxu0 %v1828_v12  ;;  %1074 = vmatpush.bf16.msra.mxu2 %v2032_v21  ;;  %v1803_v30 = vld [vmem:[%s3792_s1 + $0x60] sm:$0xf]  ;;  %v2490_v31 = vld [vmem:[%s3792_s1 + $0x68] sm:$0xf0]  ;;  %v1912_v32 = vor.u32 %v2517_v24, %v1911_v23  ;;  %v2020_v34 = vor.u32 %v2544_v29, %v2019_v27 }
   0x9   :  { %1062 = vmatpush.bf16.msra.mxu1 %v1924_v16  ;;  %v2104_v33 = vor.u32 %v2565_v26, %v2103_v25  ;;  %v1899_v35 = vld [vmem:[%s3792_s1 + $0x120] sm:$0xf]  ;;  %v2514_v36 = vld [vmem:[%s3792_s1 + $0x128] sm:$0xf0]  ;;  %v2007_v39 = vld [vmem:[%s3792_s1 + $0x1f8] sm:$0xf]  ;;  %v1804_v41 = vor.u32 %v2490_v31, %v1803_v30 }
   0xa   :  { %1088 = vmatpush.bf16.msra.mxu3 %v2116_v17  ;;  %v2091_v37 = vld [vmem:[%s3792_s1 + $0x2a0] sm:$0xf]  ;;  %v2562_v38 = vld [vmem:[%s3792_s1 + $0x2a8] sm:$0xf0]  ;;  %v2541_v40 = vld [vmem:[%s3792_s1 + $0x200] sm:$0xf0]  ;;  %v1900_v45 = vor.u32 %v2514_v36, %v1899_v35 }
   0xb   :  { %v2008_v42 = vor.u32 %v2541_v40, %v2007_v39  ;;  %v1791_v43 = vld [vmem:[%s3792_s1 + $0x48] sm:$0xf]  ;;  %v2487_v44 = vld [vmem:[%s3792_s1 + $0x50] sm:$0xf0]  ;;  %v2092_v46 = vor.u32 %v2562_v38, %v2091_v37  ;;  %v1995_v48 = vld [vmem:[%s3792_s1 + $0x1e0] sm:$0xf] }
   0xc   :  { %1050 = vmatpush.bf16.msra.mxu0 %v1816_v28  ;;  %1075 = vmatpush.bf16.msra.mxu2 %v2020_v34  ;;  %v1887_v47 = vld [vmem:[%s3792_s1 + $0x108] sm:$0xf]  ;;  %v2538_v49 = vld [vmem:[%s3792_s1 + $0x1e8] sm:$0xf0]  ;;  %v2511_v50 = vld [vmem:[%s3792_s1 + $0x110] sm:$0xf0]  ;;  %v1792_v53 = vor.u32 %v2487_v44, %v1791_v43 }
   0xd   :  { %1063 = vmatpush.bf16.msra.mxu1 %v1912_v32  ;;  %v2079_v51 = vld [vmem:[%s3792_s1 + $0x288] sm:$0xf]  ;;  %v2559_v52 = vld [vmem:[%s3792_s1 + $0x290] sm:$0xf0]  ;;  %v1996_v54 = vor.u32 %v2538_v49, %v1995_v48  ;;  %v1779_v55 = vld [vmem:[%s3792_s1 + $0x30] sm:$0xf]  ;;  %v1888_v57 = vor.u32 %v2511_v50, %v1887_v47 }
   0xe   :  { %1089 = vmatpush.bf16.msra.mxu3 %v2104_v33  ;;  %v2484_v56 = vld [vmem:[%s3792_s1 + $0x38] sm:$0xf0]  ;;  %v2080_v58 = vor.u32 %v2559_v52, %v2079_v51  ;;  %v1875_v59 = vld [vmem:[%s3792_s1 + $0xf0] sm:$0xf]  ;;  %v1983_v60 = vld [vmem:[%s3792_s1 + $0x1c8] sm:$0xf] }
   0xf   :  { %v2535_v61 = vld [vmem:[%s3792_s1 + $0x1d0] sm:$0xf0]  ;;  %v2508_v62 = vld [vmem:[%s3792_s1 + $0xf8] sm:$0xf0]  ;;  %v2067_v63 = vld [vmem:[%s3792_s1 + $0x270] sm:$0xf]  ;;  %v1780_v1 = vor.u32 %v2484_v56, %v1779_v55 }
  0x10   :  { %1051 = vmatpush.bf16.msra.mxu0 %v1804_v41  ;;  %1076 = vmatpush.bf16.msra.mxu2 %v2008_v42  ;;  %v2556_v0 = vld [vmem:[%s3792_s1 + $0x278] sm:$0xf0]  ;;  %v1984_v2 = vor.u32 %v2535_v61, %v1983_v60  ;;  %v1767_v3 = vld [vmem:[%s3792_s1 + $0x18] sm:$0xf]  ;;  %v2481_v4 = vld [vmem:[%s3792_s1 + $0x20] sm:$0xf0]  ;;  %v1876_v5 = vor.u32 %v2508_v62, %v1875_v59 }
  0x11   :  { %1064 = vmatpush.bf16.msra.mxu1 %v1900_v45  ;;  %v2068_v6 = vor.u32 %v2556_v0, %v2067_v63  ;;  %v1863_v7 = vld [vmem:[%s3792_s1 + $0xd8] sm:$0xf]  ;;  %v1971_v8 = vld [vmem:[%s3792_s1 + $0x1b0] sm:$0xf]  ;;  %v2532_v9 = vld [vmem:[%s3792_s1 + $0x1b8] sm:$0xf0]  ;;  %v1768_v14 = vor.u32 %v2481_v4, %v1767_v3 }
  0x12   :  { %1090 = vmatpush.bf16.msra.mxu3 %v2092_v46  ;;  %v2505_v10 = vld [vmem:[%s3792_s1 + $0xe0] sm:$0xf0]  ;;  %v2055_v11 = vld [vmem:[%s3792_s1 + $0x258] sm:$0xf]  ;;  %v1755_v13 = vld [vmem:[%s3792_s1] sm:$0xf]  ;;  %v1972_v15 = vor.u32 %v2532_v9, %v1971_v8 }
  0x13   :  { %v2553_v12 = vld [vmem:[%s3792_s1 + $0x260] sm:$0xf0]  ;;  %v2478_v16 = vld [vmem:[%s3792_s1 + $0x8] sm:$0xf0]  ;;  %v1851_v17 = vld [vmem:[%s3792_s1 + $0xc0] sm:$0xf]  ;;  %v1864_v19 = vor.u32 %v2505_v10, %v1863_v7 }
  0x14   :  { %1052 = vmatpush.bf16.msra.mxu0 %v1792_v53  ;;  %1077 = vmatpush.bf16.msra.mxu2 %v1996_v54  ;;  %v2502_v18 = vld [vmem:[%s3792_s1 + $0xc8] sm:$0xf0]  ;;  %v2056_v20 = vor.u32 %v2553_v12, %v2055_v11  ;;  %v2043_v21 = vld [vmem:[%s3792_s1 + $0x240] sm:$0xf]  ;;  %v1959_v22 = vld [vmem:[%s3792_s1 + $0x198] sm:$0xf]  ;;  %v1756_v30 = vor.u32 %v2478_v16, %v1755_v13 }
  0x15   :  { %1065 = vmatpush.bf16.msra.mxu1 %v1888_v57  ;;  %v2529_v23 = vld [vmem:[%s3792_s1 + $0x1a0] sm:$0xf0]  ;;  %v2550_v24 = vld [vmem:[%s3792_s1 + $0x248] sm:$0xf0]  ;;  %v2223_v25 = vld [vmem:[%s3792_s1 + $0x3a8] sm:$0xf]  ;;  %v1852_v35 = vor.u32 %v2502_v18, %v1851_v17 }
  0x16   :  { %1091 = vmatpush.bf16.msra.mxu3 %v2080_v58  ;;  %v2595_v26 = vld [vmem:[%s3792_s1 + $0x3b0] sm:$0xf0]  ;;  %v2319_v27 = vld [vmem:[%s3792_s1 + $0x468] sm:$0xf]  ;;  %v1960_v31 = vor.u32 %v2529_v23, %v1959_v22  ;;  %v2498_v32 = vld [vmem:[%s3792_s1 + $0xac] sm:$0xf]  ;;  %v2044_v36 = vor.u32 %v2550_v24, %v2043_v21 }
  0x17   :  { %v2619_v28 = vld [vmem:[%s3792_s1 + $0x470] sm:$0xf0]  ;;  %v29_v29 = vld [vmem:[%s3791_s0 + $0x8] sm:$0xff]  ;;  %v1841_v33 = vld [vmem:[%s3792_s1 + $0xb4] sm:$0xf0]  ;;  %v2224_v39 = vor.u32 %v2595_v26, %v2223_v25 }
  0x18   :  { %1053 = vmatpush.bf16.msra.mxu0 %v1780_v1  ;;  %1078 = vmatpush.bf16.msra.mxu2 %v1984_v2  ;;  %v243_v34 = vunpack.c.h.b16 %v29_v29  ;;  %v1947_v37 = vld [vmem:[%s3792_s1 + $0x180] sm:$0xf]  ;;  %v2526_v38 = vld [vmem:[%s3792_s1 + $0x188] sm:$0xf0]  ;;  %v2320_v40 = vor.u32 %v2619_v28, %v2319_v27  ;;  %v2211_v41 = vld [vmem:[%s3792_s1 + $0x390] sm:$0xf]  ;;  %v1844_v44 = vor.u32 %v2498_v32, %v1841_v33  ;;  %v242_v48 = vunpack.c.l.b16 %v29_v29 }
  0x19   :  { %1066 = vmatpush.bf16.msra.mxu1 %v1876_v5  ;;  %v2331_v42 = vld [vmem:[%s3792_s1 + $0x480] sm:$0xf]  ;;  %v2622_v43 = vld [vmem:[%s3792_s1 + $0x488] sm:$0xf0]  ;;  %v2592_v45 = vld [vmem:[%s3792_s1 + $0x398] sm:$0xf0]  ;;  %v1948_v49 = vor.u32 %v2526_v38, %v1947_v37 }
  0x1a   :  { %1092 = vmatpush.bf16.msra.mxu3 %v2068_v6  ;;  %v2307_v46 = vld [vmem:[%s3792_s1 + $0x450] sm:$0xf]  ;;  %v2616_v47 = vld [vmem:[%s3792_s1 + $0x458] sm:$0xf0]  ;;  %v2495_v50 = vld [vmem:[%s3792_s1 + $0x94] sm:$0xf]  ;;  %v2986_v53 = vpack.c.b16 %v243_v34, %v243_v34  ;;  %v2332_v54 = vor.u32 %v2622_v43, %v2331_v42  ;;  %v2212_v59 = vor.u32 %v2592_v45, %v2211_v41  ;;  %v2997_v63 = vpack.c.b16 %v242_v48, %v242_v48 }
  0x1b   :  { %v1829_v51 = vld [vmem:[%s3792_s1 + $0x9c] sm:$0xf0]  ;;  %v2522_v55 = vld [vmem:[%s3792_s1 + $0x16c] sm:$0xf]  ;;  %v1937_v56 = vld [vmem:[%s3792_s1 + $0x174] sm:$0xf0]  ;;  %v2308_v60 = vor.u32 %v2616_v47, %v2307_v46 }
  0x1c   :  { %1054 = vmatpush.bf16.msra.mxu0 %v1768_v14  ;;  %1079 = vmatpush.bf16.msra.mxu2 %v1972_v15  ;;  %v28_v52 = vld [vmem:[%s3791_s0] sm:$0xff]  ;;  %v2199_v61 = vld [vmem:[%s3792_s1 + $0x378] sm:$0xf]  ;;  %v1832_v62 = vor.u32 %v2495_v50, %v1829_v51  ;;  %v2492_v4 = vld [vmem:[%s3792_s1 + $0x7c] sm:$0xf]  ;;  %v1940_v6 = vor.u32 %v2522_v55, %v1937_v56 }
  0x1d   :  { %1067 = vmatpush.bf16.msra.mxu1 %v1864_v19  ;;  %v240_v57 = vunpack.c.l.b16 %v28_v52  ;;  %v241_v58 = vunpack.c.h.b16 %v28_v52  ;;  %v2589_v0 = vld [vmem:[%s3792_s1 + $0x380] sm:$0xf0]  ;;  %v2295_v1 = vld [vmem:[%s3792_s1 + $0x438] sm:$0xf]  ;;  %v1817_v5 = vld [vmem:[%s3792_s1 + $0x84] sm:$0xf0] }
  0x1e   :  { %1093 = vmatpush.bf16.msra.mxu3 %v2056_v20  ;;  %v2613_v2 = vld [vmem:[%s3792_s1 + $0x440] sm:$0xf0]  ;;  %v2519_v8 = vld [vmem:[%s3792_s1 + $0x154] sm:$0xf]  ;;  %v1925_v9 = vld [vmem:[%s3792_s1 + $0x15c] sm:$0xf0]  ;;  %v2200_v10 = vor.u32 %v2589_v0, %v2199_v61  ;;  %v1820_v13 = vor.u32 %v2492_v4, %v1817_v5 }
  0x1f   :  { %v3008_v3 = vpack.c.b16 %v240_v57, %v240_v57  ;;  %v3016_v7 = vpack.c.b16 %v241_v58, %v241_v58  ;;  %v2296_v11 = vor.u32 %v2613_v2, %v2295_v1  ;;  %v2187_v12 = vld [vmem:[%s3792_s1 + $0x360] sm:$0xf]  ;;  %v2586_v14 = vld [vmem:[%s3792_s1 + $0x368] sm:$0xf0]  ;;  %v2489_v17 = vld [vmem:[%s3792_s1 + $0x64] sm:$0xf]  ;;  %v1928_v19 = vor.u32 %v2519_v8, %v1925_v9 }
  0x20   :  { %1055 = vmatpush.bf16.msra.mxu0 %v1756_v30  ;;  %1080 = vmatpush.bf16.msra.mxu2 %v1960_v31  ;;  %v2283_v15 = vld [vmem:[%s3792_s1 + $0x420] sm:$0xf]  ;;  %v2610_v16 = vld [vmem:[%s3792_s1 + $0x428] sm:$0xf0]  ;;  %v1805_v18 = vld [vmem:[%s3792_s1 + $0x6c] sm:$0xf0]  ;;  %v2188_v22 = vor.u32 %v2586_v14, %v2187_v12 }
  0x21   :  { %1068 = vmatpush.bf16.msra.mxu1 %v1852_v35  ;;  %v2516_v20 = vld [vmem:[%s3792_s1 + $0x13c] sm:$0xf]  ;;  %v1913_v21 = vld [vmem:[%s3792_s1 + $0x144] sm:$0xf0]  ;;  %v2284_v23 = vor.u32 %v2610_v16, %v2283_v15  ;;  %v1808_v25 = vor.u32 %v2489_v17, %v1805_v18  ;;  %v2583_v26 = vld [vmem:[%s3792_s1 + $0x350] sm:$0xf0] }
  0x22   :  { %1094 = vmatpush.bf16.msra.mxu3 %v2044_v36  ;;  %v2175_v24 = vld [vmem:[%s3792_s1 + $0x348] sm:$0xf]  ;;  %v2607_v28 = vld [vmem:[%s3792_s1 + $0x410] sm:$0xf0]  ;;  %v2486_v29 = vld [vmem:[%s3792_s1 + $0x4c] sm:$0xf]  ;;  %v1916_v31 = vor.u32 %v2516_v20, %v1913_v21 }
  0x23   :  { %1056 = vmatmul.bf16.vlgmr.msra.gmra.mxu0 %v3008_v3  ;;  %v2271_v27 = vld [vmem:[%s3792_s1 + $0x408] sm:$0xf]  ;;  %v1793_v30 = vld [vmem:[%s3792_s1 + $0x54] sm:$0xf0]  ;;  %v2513_v33 = vld [vmem:[%s3792_s1 + $0x124] sm:$0xf]  ;;  %v2176_v35 = vor.u32 %v2583_v26, %v2175_v24 }
  0x24   :  { %1100 = vmatpush.bf16.msrb.mxu0 %v2224_v39  ;;  %1081 = vmatpush.bf16.msra.mxu2 %v1948_v49  ;;  %v31_v32 = vld [vmem:[%s3791_s0 + $0x18] sm:$0xf]  ;;  %v1901_v34 = vld [vmem:[%s3792_s1 + $0x12c] sm:$0xf0]  ;;  %v2272_v36 = vor.u32 %v2607_v28, %v2271_v27  ;;  %v1796_v38 = vor.u32 %v2486_v29, %v1793_v30  ;;  %v2580_v39 = vld [vmem:[%s3792_s1 + $0x338] sm:$0xf0] }
  0x25   :  { %1113 = vmatpush.bf16.msrb.mxu1 %v2320_v40  ;;  %1095 = vmatmul.bf16.vlgmr.msra.gmra.mxu3 %v2986_v53  ;;  %v2163_v37 = vld [vmem:[%s3792_s1 + $0x330] sm:$0xf]  ;;  %v2604_v41 = vld [vmem:[%s3792_s1 + $0x3f8] sm:$0xf0]  ;;  %v246_v42 = vunpack.c.l.b16 %v31_v32  ;;  %v2483_v43 = vld [vmem:[%s3792_s1 + $0x34] sm:$0xf]  ;;  %v1904_v45 = vor.u32 %v2513_v33, %v1901_v34 }
  0x26   :  { %1139 = vmatpush.bf16.msrb.mxu3 %v1844_v44  ;;  %1069 = vmatmul.bf16.vlgmr.msra.gmra.mxu1 %v3016_v7  ;;  %v2259_v40 = vld [vmem:[%s3792_s1 + $0x3f0] sm:$0xf]  ;;  %v1781_v44 = vld [vmem:[%s3792_s1 + $0x3c] sm:$0xf0]  ;;  %v2510_v46 = vld [vmem:[%s3792_s1 + $0x10c] sm:$0xf]  ;;  %v2164_v48 = vor.u32 %v2580_v39, %v2163_v37 }
  0x27   :  { %1082 = vmatmul.bf16.vlgmr.msra.gmra.mxu2 %v2997_v63  ;;  %v1889_v47 = vld [vmem:[%s3792_s1 + $0x114] sm:$0xf0]  ;;  %v2260_v49 = vor.u32 %v2604_v41, %v2259_v40  ;;  %v1784_v51 = vor.u32 %v2483_v43, %v1781_v44  ;;  %v2577_v52 = vld [vmem:[%s3792_s1 + $0x320] sm:$0xf0]  ;;  %v3115_v56 = vpack.c.b16 %v246_v42, %v246_v42  ;;  %v2480_v57 = vld [vmem:[%s3792_s1 + $0x1c] sm:$0xf] }
  0x28   :  { %1133 = vmatpush.bf16.msrb.mxu2 %v2332_v54  ;;  %1101 = vmatpush.bf16.msrb.mxu0 %v2212_v59  ;;  %v2151_v50 = vld [vmem:[%s3792_s1 + $0x318] sm:$0xf]  ;;  %v2601_v55 = vld [vmem:[%s3792_s1 + $0x3e0] sm:$0xf0]  ;;  %v1769_v58 = vld [vmem:[%s3792_s1 + $0x24] sm:$0xf0]  ;;  %v1892_v59 = vor.u32 %v2510_v46, %v1889_v47 }
  0x29   :  { %1114 = vmatpush.bf16.msrb.mxu1 %v2308_v60  ;;  %v2247_v54 = vld [vmem:[%s3792_s1 + $0x3d8] sm:$0xf]  ;;  %v2139_v60 = vld [vmem:[%s3792_s1 + $0x300] sm:$0xf]  ;;  %v2507_v61 = vld [vmem:[%s3792_s1 + $0xf4] sm:$0xf]  ;;  %v2152_v0 = vor.u32 %v2577_v52, %v2151_v50 }
  0x2a   :  { %1140 = vmatpush.bf16.msrb.mxu3 %v1832_v62  ;;  %v1877_v62 = vld [vmem:[%s3792_s1 + $0xfc] sm:$0xf0]  ;;  %v2248_v1 = vor.u32 %v2601_v55, %v2247_v54  ;;  %v2574_v2 = vld [vmem:[%s3792_s1 + $0x308] sm:$0xf0]  ;;  %v30_v5 = vld [vmem:[%s3791_s0 + $0x10] sm:$0xff] }
  0x2b   :  { %v2235_v4 = vld [vmem:[%s3792_s1 + $0x3c0] sm:$0xf]  ;;  %v2598_v8 = vld [vmem:[%s3792_s1 + $0x3c8] sm:$0xf0]  ;;  %v2477_v9 = vld [vmem:[%s3792_s1 + $0x4] sm:$0xf]  ;;  %v244_v18 = vunpack.c.l.b16 %v30_v5 }
  0x2c   :  { %1152 = vmatpush.bf16.msra.mxu2 %v1940_v6  ;;  %1102 = vmatpush.bf16.msrb.mxu0 %v2200_v10  ;;  %v1772_v6 = vor.u32 %v2480_v57, %v1769_v58  ;;  %v1757_v10 = vld [vmem:[%s3792_s1 + $0xc] sm:$0xf0]  ;;  %v2546_v12 = vld [vmem:[%s3792_s1 + $0x22c] sm:$0xf]  ;;  %v2129_v15 = vld [vmem:[%s3792_s1 + $0x2f4] sm:$0xf0]  ;;  %v2236_v20 = vor.u32 %v2598_v8, %v2235_v4 }
  0x2d   :  { %1115 = vmatpush.bf16.msrb.mxu1 %v2296_v11  ;;  %v1880_v11 = vor.u32 %v2507_v61, %v1877_v62  ;;  %v2570_v14 = vld [vmem:[%s3792_s1 + $0x2ec] sm:$0xf]  ;;  %v2225_v17 = vld [vmem:[%s3792_s1 + $0x3b4] sm:$0xf0]  ;;  %v2504_v21 = vld [vmem:[%s3792_s1 + $0xdc] sm:$0xf]  ;;  %v1760_v24 = vor.u32 %v2477_v9, %v1757_v10 }
  0x2e   :  { %1141 = vmatpush.bf16.msrb.mxu3 %v1820_v13  ;;  %v2033_v13 = vld [vmem:[%s3792_s1 + $0x234] sm:$0xf0]  ;;  %v2594_v16 = vld [vmem:[%s3792_s1 + $0x3ac] sm:$0xf]  ;;  %v2132_v26 = vor.u32 %v2570_v14, %v2129_v15  ;;  %v2543_v28 = vld [vmem:[%s3792_s1 + $0x214] sm:$0xf] }
  0x2f   :  { %v2228_v27 = vor.u32 %v2594_v16, %v2225_v17  ;;  %v2021_v29 = vld [vmem:[%s3792_s1 + $0x21c] sm:$0xf0]  ;;  %v2567_v30 = vld [vmem:[%s3792_s1 + $0x2d4] sm:$0xf]  ;;  %v2501_v37 = vld [vmem:[%s3792_s1 + $0xc4] sm:$0xf] }
  0x30   :  { %1153 = vmatpush.bf16.msra.mxu2 %v1928_v19  ;;  %1103 = vmatpush.bf16.msrb.mxu0 %v2188_v22  ;;  %v2140_v19 = vor.u32 %v2574_v2, %v2139_v60  ;;  %v1865_v22 = vld [vmem:[%s3792_s1 + $0xe4] sm:$0xf0]  ;;  %v2117_v33 = vld [vmem:[%s3792_s1 + $0x2dc] sm:$0xf0]  ;;  %v2591_v34 = vld [vmem:[%s3792_s1 + $0x394] sm:$0xf]  ;;  %v2024_v39 = vor.u32 %v2543_v28, %v2021_v29 }
  0x31   :  { %1116 = vmatpush.bf16.msrb.mxu1 %v2284_v23  ;;  %v245_v23 = vunpack.c.h.b16 %v30_v5  ;;  %v1868_v32 = vor.u32 %v2504_v21, %v1865_v22  ;;  %v2618_v40 = vld [vmem:[%s3792_s1 + $0x46c] sm:$0xf]  ;;  %v2321_v41 = vld [vmem:[%s3792_s1 + $0x474] sm:$0xf0]  ;;  %v2120_v42 = vor.u32 %v2567_v30, %v2117_v33  ;;  %v2540_v44 = vld [vmem:[%s3792_s1 + $0x1fc] sm:$0xf] }
  0x32   :  { %1142 = vmatpush.bf16.msrb.mxu3 %v1808_v25  ;;  %v2036_v25 = vor.u32 %v2546_v12, %v2033_v13  ;;  %v2564_v46 = vld [vmem:[%s3792_s1 + $0x2bc] sm:$0xf]  ;;  %v2201_v50 = vld [vmem:[%s3792_s1 + $0x384] sm:$0xf0]  ;;  %v2615_v54 = vld [vmem:[%s3792_s1 + $0x454] sm:$0xf] }
  0x33   :  { %v2309_v55 = vld [vmem:[%s3792_s1 + $0x45c] sm:$0xf0]  ;;  %v1997_v60 = vld [vmem:[%s3792_s1 + $0x1ec] sm:$0xf0]  ;;  %v2561_v61 = vld [vmem:[%s3792_s1 + $0x2a4] sm:$0xf] }
  0x34   :  { %1154 = vmatpush.bf16.msra.mxu2 %v1916_v31  ;;  %1104 = vmatpush.bf16.msrb.mxu0 %v2176_v35  ;;  %v3185_v31 = vpack.c.b16 %v244_v18, %v244_v18  ;;  %v2213_v35 = vld [vmem:[%s3792_s1 + $0x39c] sm:$0xf0]  ;;  %v2093_v62 = vld [vmem:[%s3792_s1 + $0x2ac] sm:$0xf0]  ;;  %v2312_v2 = vor.u32 %v2615_v54, %v2309_v55  ;;  %v2612_v5 = vld [vmem:[%s3792_s1 + $0x43c] sm:$0xf] }
  0x35   :  { %1117 = vmatpush.bf16.msrb.mxu1 %v2272_v36  ;;  %v3196_v36 = vpack.c.b16 %v245_v23, %v245_v23  ;;  %v2216_v43 = vor.u32 %v2591_v34, %v2213_v35  ;;  %v2096_v8 = vor.u32 %v2561_v61, %v2093_v62  ;;  %v2534_v10 = vld [vmem:[%s3792_s1 + $0x1cc] sm:$0xf]  ;;  %v2081_v13 = vld [vmem:[%s3792_s1 + $0x294] sm:$0xf0]  ;;  %v2531_v17 = vld [vmem:[%s3792_s1 + $0x1b4] sm:$0xf] }
  0x36   :  { %1143 = vmatpush.bf16.msrb.mxu3 %v1796_v38  ;;  %v1853_v38 = vld [vmem:[%s3792_s1 + $0xcc] sm:$0xf0]  ;;  %v2558_v12 = vld [vmem:[%s3792_s1 + $0x28c] sm:$0xf]  ;;  %v2177_v15 = vld [vmem:[%s3792_s1 + $0x354] sm:$0xf0] }
  0x37   :  { %2341 = vmatmul.msk.bf16.vlgmr.msrb.gmra.mxu2 %vm1044_vm0, %v3115_v56  ;;  %v1856_v47 = vor.u32 %v2501_v37, %v1853_v38  ;;  %v2582_v14 = vld [vmem:[%s3792_s1 + $0x34c] sm:$0xf]  ;;  %v1973_v18 = vld [vmem:[%s3792_s1 + $0x1bc] sm:$0xf0]  ;;  %v2609_v21 = vld [vmem:[%s3792_s1 + $0x424] sm:$0xf]  ;;  %v2084_v23 = vor.u32 %v2558_v12, %v2081_v13 }
  0x38   :  { %1155 = vmatpush.bf16.msra.mxu2 %v1904_v45  ;;  %1105 = vmatpush.bf16.msrb.mxu0 %v2164_v48  ;;  %v2009_v45 = vld [vmem:[%s3792_s1 + $0x204] sm:$0xf0]  ;;  %v2285_v22 = vld [vmem:[%s3792_s1 + $0x42c] sm:$0xf0] }
  0x39   :  { %1118 = vmatpush.bf16.msrb.mxu1 %v2260_v49  ;;  %v2105_v48 = vld [vmem:[%s3792_s1 + $0x2c4] sm:$0xf0]  ;;  %v2588_v49 = vld [vmem:[%s3792_s1 + $0x37c] sm:$0xf]  ;;  %v2012_v52 = vor.u32 %v2540_v44, %v2009_v45 }
  0x3a   :  { %1144 = vmatpush.bf16.msrb.mxu3 %v1784_v51  ;;  %v2324_v51 = vor.u32 %v2618_v40, %v2321_v41  ;;  %v2108_v57 = vor.u32 %v2564_v46, %v2105_v48  ;;  %v2204_v58 = vor.u32 %v2588_v49, %v2201_v50 }
  0x3c   :  { %1156 = vmatpush.bf16.msra.mxu2 %v1892_v59  ;;  %1106 = vmatpush.bf16.msrb.mxu0 %v2152_v0  ;;  %v2537_v59 = vld [vmem:[%s3792_s1 + $0x1e4] sm:$0xf] }
  0x3d   :  { %1119 = vmatpush.bf16.msrb.mxu1 %v2248_v1  ;;  %v2585_v0 = vld [vmem:[%s3792_s1 + $0x364] sm:$0xf]  ;;  %v2189_v1 = vld [vmem:[%s3792_s1 + $0x36c] sm:$0xf0]  ;;  %v2000_v4 = vor.u32 %v2537_v59, %v1997_v60 }
  0x3e   :  { %1145 = vmatpush.bf16.msrb.mxu3 %v1772_v6  ;;  %v2297_v6 = vld [vmem:[%s3792_s1 + $0x444] sm:$0xf0]  ;;  %v2192_v9 = vor.u32 %v2585_v0, %v2189_v1 }
  0x3f   :  { %v2300_v16 = vor.u32 %v2612_v5, %v2297_v6 }
  0x40   :  { %1157 = vmatpush.bf16.msra.mxu2 %v1880_v11  ;;  %1107 = vmatpush.bf16.msrb.mxu0 %v2140_v19  ;;  %v1985_v11 = vld [vmem:[%s3792_s1 + $0x1d4] sm:$0xf0] }
  0x41   :  { %1120 = vmatpush.bf16.msrb.mxu1 %v2236_v20  ;;  %v1988_v19 = vor.u32 %v2534_v10, %v1985_v11  ;;  %v2555_v20 = vld [vmem:[%s3792_s1 + $0x274] sm:$0xf] }
  0x42   :  { %1146 = vmatpush.bf16.msrb.mxu3 %v1760_v24  ;;  %v2180_v24 = vor.u32 %v2582_v14, %v2177_v15 }
  0x43   :  { %1108 = vmatmul.bf16.vlgmr.msrb.gmra.mxu0 %v3185_v31 }
  0x44   :  { %1165 = vmatpush.bf16.msra.mxu0 %v2036_v25  ;;  %1158 = vmatpush.bf16.msra.mxu2 %v1868_v32  ;;  %v2069_v25 = vld [vmem:[%s3792_s1 + $0x27c] sm:$0xf0] }
  0x45   :  { %1178 = vmatpush.bf16.msra.mxu1 %v2132_v26  ;;  %1147 = vmatmul.bf16.vlgmr.msrb.gmra.mxu3 %v3008_v3  ;;  %v2579_v26 = vld [vmem:[%s3792_s1 + $0x334] sm:$0xf] }
  0x46   :  { %1191 = vmatpush.bf16.msra.mxu3 %v2228_v27  ;;  %1121 = vmatmul.bf16.vlgmr.msrb.gmra.mxu1 %v3196_v36  ;;  %v2165_v27 = vld [vmem:[%s3792_s1 + $0x33c] sm:$0xf0] }
  0x48   :  { %1166 = vmatpush.bf16.msra.mxu0 %v2024_v39  ;;  %1159 = vmatpush.bf16.msra.mxu2 %v1856_v47 }
  0x49   :  { %1179 = vmatpush.bf16.msra.mxu1 %v2120_v42 }
  0x4a   :  { %1192 = vmatpush.bf16.msra.mxu3 %v2216_v43 }
  0x4b   :  { %1160 = vmatmul.bf16.vlgmr.msra.gmra.mxu2 %v3016_v7 }
  0x4c   :  { %1204 = vmatpush.bf16.msrb.mxu2 %v2324_v51  ;;  %1167 = vmatpush.bf16.msra.mxu0 %v2012_v52 }
  0x4d   :  { %1180 = vmatpush.bf16.msra.mxu1 %v2108_v57 }
  0x4e   :  { %1193 = vmatpush.bf16.msra.mxu3 %v2204_v58 }
  0x50   :  { %1205 = vmatpush.bf16.msrb.mxu2 %v2312_v2  ;;  %1168 = vmatpush.bf16.msra.mxu0 %v2000_v4 }
  0x51   :  { %1181 = vmatpush.bf16.msra.mxu1 %v2096_v8 }
  0x52   :  { %1194 = vmatpush.bf16.msra.mxu3 %v2192_v9 }
  0x53   :  { %12 = vsyncpa [#allocation3], 0  ;;  %v2288_v28 = vor.u32 %v2609_v21, %v2285_v22  ;;  %v1976_v29 = vor.u32 %v2531_v17, %v1973_v18  ;;  %v2606_v30 = vld [vmem:[%s3792_s1 + $0x40c] sm:$0xf]  ;;  %v2273_v32 = vld [vmem:[%s3792_s1 + $0x414] sm:$0xf0]  ;;  %v2072_v33 = vor.u32 %v2555_v20, %v2069_v25  ;;  %v2168_v34 = vor.u32 %v2579_v26, %v2165_v27 }
  0x54   :  { %1206 = vmatpush.bf16.msrb.mxu2 %v2300_v16  ;;  %1169 = vmatpush.bf16.msra.mxu0 %v1988_v19  ;;  %v2528_v35 = vld [vmem:[%s3792_s1 + $0x19c] sm:$0xf]  ;;  %v1961_v37 = vld [vmem:[%s3792_s1 + $0x1a4] sm:$0xf0]  ;;  %v2276_v42 = vor.u32 %v2606_v30, %v2273_v32  ;;  %v2525_v44 = vld [vmem:[%s3792_s1 + $0x184] sm:$0xf] }
  0x55   :  { %1182 = vmatpush.bf16.msra.mxu1 %v2084_v23  ;;  %v2552_v38 = vld [vmem:[%s3792_s1 + $0x25c] sm:$0xf]  ;;  %v2057_v39 = vld [vmem:[%s3792_s1 + $0x264] sm:$0xf0]  ;;  %v1964_v43 = vor.u32 %v2528_v35, %v1961_v37  ;;  %v2603_v45 = vld [vmem:[%s3792_s1 + $0x3f4] sm:$0xf] }
  0x56   :  { %1195 = vmatpush.bf16.msra.mxu3 %v2180_v24  ;;  %v2576_v40 = vld [vmem:[%s3792_s1 + $0x31c] sm:$0xf]  ;;  %v2153_v41 = vld [vmem:[%s3792_s1 + $0x324] sm:$0xf0]  ;;  %v2261_v46 = vld [vmem:[%s3792_s1 + $0x3fc] sm:$0xf0]  ;;  %v2060_v47 = vor.u32 %v2552_v38, %v2057_v39 }
  0x57   :  { %v2156_v48 = vor.u32 %v2576_v40, %v2153_v41  ;;  %v1949_v49 = vld [vmem:[%s3792_s1 + $0x18c] sm:$0xf0]  ;;  %v2549_v50 = vld [vmem:[%s3792_s1 + $0x244] sm:$0xf]  ;;  %v2264_v57 = vor.u32 %v2603_v45, %v2261_v46  ;;  %v2500_v58 = vld [vmem:[%s3792_s1 + $0xb8] sm:$0xf0] }
  0x58   :  { %1207 = vmatpush.bf16.msrb.mxu2 %v2288_v28  ;;  %1170 = vmatpush.bf16.msra.mxu0 %v1976_v29  ;;  %v2045_v51 = vld [vmem:[%s3792_s1 + $0x24c] sm:$0xf0]  ;;  %v2573_v52 = vld [vmem:[%s3792_s1 + $0x304] sm:$0xf]  ;;  %v2524_v60 = vld [vmem:[%s3792_s1 + $0x178] sm:$0xf0]  ;;  %v1952_v61 = vor.u32 %v2525_v44, %v1949_v49 }
  0x59   :  { %1183 = vmatpush.bf16.msra.mxu1 %v2072_v33  ;;  %v2141_v54 = vld [vmem:[%s3792_s1 + $0x30c] sm:$0xf0]  ;;  %v2600_v62 = vld [vmem:[%s3792_s1 + $0x3dc] sm:$0xf]  ;;  %v2249_v0 = vld [vmem:[%s3792_s1 + $0x3e4] sm:$0xf0]  ;;  %v2048_v1 = vor.u32 %v2549_v50, %v2045_v51 }
  0x5a   :  { %1196 = vmatpush.bf16.msra.mxu3 %v2168_v34  ;;  %v1847_v55 = vld [vmem:[%s3792_s1 + $0xb0] sm:$0xf]  ;;  %v2144_v2 = vor.u32 %v2573_v52, %v2141_v54  ;;  %v1835_v4 = vld [vmem:[%s3792_s1 + $0x98] sm:$0xf]  ;;  %v2497_v8 = vld [vmem:[%s3792_s1 + $0xa0] sm:$0xf0]  ;;  %v2252_v11 = vor.u32 %v2600_v62, %v2249_v0 }
  0x5b   :  { %v1943_v59 = vld [vmem:[%s3792_s1 + $0x170] sm:$0xf]  ;;  %v1848_v5 = vor.u32 %v2500_v58, %v1847_v55  ;;  %v2621_v9 = vld [vmem:[%s3792_s1 + $0x484] sm:$0xf]  ;;  %v1931_v12 = vld [vmem:[%s3792_s1 + $0x158] sm:$0xf]  ;;  %v1836_v21 = vor.u32 %v2497_v8, %v1835_v4 }
  0x5c   :  { %1208 = vmatpush.bf16.msrb.mxu2 %v2276_v42  ;;  %1171 = vmatpush.bf16.msra.mxu0 %v1964_v43  ;;  %v1944_v6 = vor.u32 %v2524_v60, %v1943_v59  ;;  %v2333_v10 = vld [vmem:[%s3792_s1 + $0x48c] sm:$0xf0]  ;;  %v2521_v13 = vld [vmem:[%s3792_s1 + $0x160] sm:$0xf0]  ;;  %v2548_v17 = vld [vmem:[%s3792_s1 + $0x238] sm:$0xf0] }
  0x5d   :  { %1184 = vmatpush.bf16.msra.mxu1 %v2060_v47  ;;  %v2597_v14 = vld [vmem:[%s3792_s1 + $0x3c4] sm:$0xf]  ;;  %v2237_v15 = vld [vmem:[%s3792_s1 + $0x3cc] sm:$0xf0]  ;;  %v2336_v18 = vor.u32 %v2621_v9, %v2333_v10  ;;  %v2572_v20 = vld [vmem:[%s3792_s1 + $0x2f8] sm:$0xf0]  ;;  %v1932_v22 = vor.u32 %v2521_v13, %v1931_v12 }
  0x5e   :  { %1197 = vmatpush.bf16.msra.mxu3 %v2156_v48  ;;  %v2039_v16 = vld [vmem:[%s3792_s1 + $0x230] sm:$0xf]  ;;  %v1823_v23 = vld [vmem:[%s3792_s1 + $0x80] sm:$0xf]  ;;  %v2240_v24 = vor.u32 %v2597_v14, %v2237_v15  ;;  %v2494_v25 = vld [vmem:[%s3792_s1 + $0x88] sm:$0xf0] }
  0x5f   :  { %v2135_v19 = vld [vmem:[%s3792_s1 + $0x2f0] sm:$0xf]  ;;  %v1919_v26 = vld [vmem:[%s3792_s1 + $0x140] sm:$0xf]  ;;  %v2518_v27 = vld [vmem:[%s3792_s1 + $0x148] sm:$0xf0]  ;;  %v2040_v28 = vor.u32 %v2548_v17, %v2039_v16  ;;  %v1824_v35 = vor.u32 %v2494_v25, %v1823_v23 }
  0x60   :  { %1209 = vmatpush.bf16.msrb.mxu2 %v2264_v57  ;;  %1172 = vmatpush.bf16.msra.mxu0 %v1952_v61  ;;  %v2027_v29 = vld [vmem:[%s3792_s1 + $0x218] sm:$0xf]  ;;  %v2545_v30 = vld [vmem:[%s3792_s1 + $0x220] sm:$0xf0]  ;;  %v2136_v32 = vor.u32 %v2572_v20, %v2135_v19  ;;  %v1920_v37 = vor.u32 %v2518_v27, %v1919_v26  ;;  %v1811_v38 = vld [vmem:[%s3792_s1 + $0x68] sm:$0xf] }
  0x61   :  { %1185 = vmatpush.bf16.msra.mxu1 %v2048_v1  ;;  %v2123_v33 = vld [vmem:[%s3792_s1 + $0x2d8] sm:$0xf]  ;;  %v2569_v34 = vld [vmem:[%s3792_s1 + $0x2e0] sm:$0xf0]  ;;  %v2491_v39 = vld [vmem:[%s3792_s1 + $0x70] sm:$0xf0]  ;;  %v2028_v42 = vor.u32 %v2545_v30, %v2027_v29 }
  0x62   :  { %1198 = vmatpush.bf16.msra.mxu3 %v2144_v2  ;;  %v1907_v40 = vld [vmem:[%s3792_s1 + $0x128] sm:$0xf]  ;;  %v2515_v41 = vld [vmem:[%s3792_s1 + $0x130] sm:$0xf0]  ;;  %v2015_v43 = vld [vmem:[%s3792_s1 + $0x200] sm:$0xf]  ;;  %v2124_v45 = vor.u32 %v2569_v34, %v2123_v33  ;;  %v1812_v48 = vor.u32 %v2491_v39, %v1811_v38 }
  0x63   :  { %1173 = vmatmul.bf16.vlgmr.msra.gmra.mxu0 %v2997_v63  ;;  %v2542_v44 = vld [vmem:[%s3792_s1 + $0x208] sm:$0xf0]  ;;  %v2111_v46 = vld [vmem:[%s3792_s1 + $0x2c0] sm:$0xf]  ;;  %v1908_v49 = vor.u32 %v2515_v41, %v1907_v40  ;;  %v1799_v50 = vld [vmem:[%s3792_s1 + $0x50] sm:$0xf] }
  0x64   :  { %1210 = vmatpush.bf16.msrb.mxu2 %v2252_v11  ;;  %1186 = vmatmul.bf16.vlgmr.msra.gmra.mxu1 %v2986_v53  ;;  %v2566_v47 = vld [vmem:[%s3792_s1 + $0x2c8] sm:$0xf0]  ;;  %v2488_v51 = vld [vmem:[%s3792_s1 + $0x58] sm:$0xf0]  ;;  %v1895_v52 = vld [vmem:[%s3792_s1 + $0x110] sm:$0xf]  ;;  %v2016_v55 = vor.u32 %v2542_v44, %v2015_v43 }
  0x65   :  { %1230 = vmatpush.bf16.msrb.mxu1 %v1848_v5  ;;  %1199 = vmatmul.bf16.vlgmr.msra.gmra.mxu3 %v3185_v31  ;;  %v2512_v54 = vld [vmem:[%s3792_s1 + $0x118] sm:$0xf0]  ;;  %v2003_v57 = vld [vmem:[%s3792_s1 + $0x1e8] sm:$0xf]  ;;  %v2112_v58 = vor.u32 %v2566_v47, %v2111_v46  ;;  %v2539_v59 = vld [vmem:[%s3792_s1 + $0x1f0] sm:$0xf0]  ;;  %v1800_v62 = vor.u32 %v2488_v51, %v1799_v50 }
  0x66   :  { %1243 = vmatpush.bf16.msrb.mxu3 %v1944_v6  ;;  %1224 = vmatpush.bf16.msrb.mxu0 %v2336_v18  ;;  %v2099_v60 = vld [vmem:[%s3792_s1 + $0x2a8] sm:$0xf]  ;;  %v2563_v61 = vld [vmem:[%s3792_s1 + $0x2b0] sm:$0xf0]  ;;  %v1896_v0 = vor.u32 %v2512_v54, %v1895_v52  ;;  %v1787_v1 = vld [vmem:[%s3792_s1 + $0x38] sm:$0xf]  ;;  %v2004_v6 = vor.u32 %v2539_v59, %v2003_v57 }
  0x67   :  { %v2485_v2 = vld [vmem:[%s3792_s1 + $0x40] sm:$0xf0]  ;;  %v1883_v4 = vld [vmem:[%s3792_s1 + $0xf8] sm:$0xf]  ;;  %v1991_v8 = vld [vmem:[%s3792_s1 + $0x1d0] sm:$0xf]  ;;  %v2100_v9 = vor.u32 %v2563_v61, %v2099_v60 }
  0x68   :  { %1211 = vmatpush.bf16.msrb.mxu2 %v2240_v24  ;;  %v2509_v5 = vld [vmem:[%s3792_s1 + $0x100] sm:$0xf0]  ;;  %v2536_v10 = vld [vmem:[%s3792_s1 + $0x1d8] sm:$0xf0]  ;;  %v2087_v11 = vld [vmem:[%s3792_s1 + $0x290] sm:$0xf]  ;;  %v1788_v13 = vor.u32 %v2485_v2, %v1787_v1 }
  0x69   :  { %1231 = vmatpush.bf16.msrb.mxu1 %v1836_v21  ;;  %v2560_v12 = vld [vmem:[%s3792_s1 + $0x298] sm:$0xf0]  ;;  %v1884_v14 = vor.u32 %v2509_v5, %v1883_v4  ;;  %v1775_v15 = vld [vmem:[%s3792_s1 + $0x20] sm:$0xf]  ;;  %v2482_v16 = vld [vmem:[%s3792_s1 + $0x28] sm:$0xf0]  ;;  %v1992_v19 = vor.u32 %v2536_v10, %v1991_v8 }
  0x6a   :  { %1244 = vmatpush.bf16.msrb.mxu3 %v1932_v22  ;;  %1256 = vmatpush.bf16.msra.mxu0 %v2040_v28  ;;  %v1871_v17 = vld [vmem:[%s3792_s1 + $0xe0] sm:$0xf]  ;;  %v2506_v18 = vld [vmem:[%s3792_s1 + $0xe8] sm:$0xf0]  ;;  %v1979_v20 = vld [vmem:[%s3792_s1 + $0x1b8] sm:$0xf]  ;;  %v2088_v21 = vor.u32 %v2560_v12, %v2087_v11  ;;  %v1776_v25 = vor.u32 %v2482_v16, %v1775_v15 }
  0x6b   :  { %1212 = vmatmul.bf16.vlgmr.msrb.gmra.mxu2 %v3196_v36  ;;  %v2533_v22 = vld [vmem:[%s3792_s1 + $0x1c0] sm:$0xf0]  ;;  %v2075_v23 = vld [vmem:[%s3792_s1 + $0x278] sm:$0xf]  ;;  %v1872_v26 = vor.u32 %v2506_v18, %v1871_v17  ;;  %v1763_v27 = vld [vmem:[%s3792_s1 + $0x8] sm:$0xf] }
  0x6c   :  { %1269 = vmatpush.bf16.msra.mxu2 %v2136_v32  ;;  %v2557_v24 = vld [vmem:[%s3792_s1 + $0x280] sm:$0xf0]  ;;  %v2479_v28 = vld [vmem:[%s3792_s1 + $0x10] sm:$0xf0]  ;;  %v1859_v29 = vld [vmem:[%s3792_s1 + $0xc8] sm:$0xf] }
  0x6d   :  { %1232 = vmatpush.bf16.msrb.mxu1 %v1824_v35  ;;  %v2503_v30 = vld [vmem:[%s3792_s1 + $0xd0] sm:$0xf0]  ;;  %v2231_v32 = vld [vmem:[%s3792_s1 + $0x3b0] sm:$0xf]  ;;  %v2596_v33 = vld [vmem:[%s3792_s1 + $0x3b8] sm:$0xf0]  ;;  %v2076_v39 = vor.u32 %v2557_v24, %v2075_v23  ;;  %v1764_v43 = vor.u32 %v2479_v28, %v1763_v27 }
  0x6e   :  { %1245 = vmatpush.bf16.msrb.mxu3 %v1920_v37  ;;  %1257 = vmatpush.bf16.msra.mxu0 %v2028_v42  ;;  %v2327_v34 = vld [vmem:[%s3792_s1 + $0x470] sm:$0xf]  ;;  %v2620_v35 = vld [vmem:[%s3792_s1 + $0x478] sm:$0xf0]  ;;  %v1980_v37 = vor.u32 %v2533_v22, %v1979_v20  ;;  %v1967_v38 = vld [vmem:[%s3792_s1 + $0x1a0] sm:$0xf]  ;;  %v1860_v44 = vor.u32 %v2503_v30, %v1859_v29 }
  0x6f   :  { %v2530_v40 = vld [vmem:[%s3792_s1 + $0x1a8] sm:$0xf0]  ;;  %v2063_v41 = vld [vmem:[%s3792_s1 + $0x260] sm:$0xf]  ;;  %v2328_v46 = vor.u32 %v2620_v35, %v2327_v34  ;;  %v2219_v47 = vld [vmem:[%s3792_s1 + $0x398] sm:$0xf] }
  0x70   :  { %1270 = vmatpush.bf16.msra.mxu2 %v2124_v45  ;;  %v2554_v42 = vld [vmem:[%s3792_s1 + $0x268] sm:$0xf0]  ;;  %v2232_v45 = vor.u32 %v2596_v33, %v2231_v32  ;;  %v2617_v50 = vld [vmem:[%s3792_s1 + $0x460] sm:$0xf0]  ;;  %v1968_v51 = vor.u32 %v2530_v40, %v1967_v38  ;;  %v1955_v52 = vld [vmem:[%s3792_s1 + $0x188] sm:$0xf] }
  0x71   :  { %1233 = vmatpush.bf16.msrb.mxu1 %v1812_v48  ;;  %v2593_v48 = vld [vmem:[%s3792_s1 + $0x3a0] sm:$0xf0]  ;;  %v2064_v54 = vor.u32 %v2554_v42, %v2063_v41  ;;  %v2051_v57 = vld [vmem:[%s3792_s1 + $0x248] sm:$0xf]  ;;  %v2623_v60 = vld [vmem:[%s3792_s1 + $0x490] sm:$0xf0] }
  0x72   :  { %1246 = vmatpush.bf16.msrb.mxu3 %v1908_v49  ;;  %1258 = vmatpush.bf16.msra.mxu0 %v2016_v55  ;;  %v2315_v49 = vld [vmem:[%s3792_s1 + $0x458] sm:$0xf]  ;;  %v2527_v55 = vld [vmem:[%s3792_s1 + $0x190] sm:$0xf0]  ;;  %v2339_v59 = vld [vmem:[%s3792_s1 + $0x488] sm:$0xf]  ;;  %v2220_v61 = vor.u32 %v2593_v48, %v2219_v47 }
  0x73   :  { %2342 = vmatmul.msk.bf16.vlgmr.msrb.gmra.mxu0 %vm1044_vm0, %v3115_v56  ;;  %v2590_v1 = vld [vmem:[%s3792_s1 + $0x388] sm:$0xf0]  ;;  %v2303_v2 = vld [vmem:[%s3792_s1 + $0x440] sm:$0xf]  ;;  %v1956_v5 = vor.u32 %v2527_v55, %v1955_v52  ;;  %v2340_v8 = vor.u32 %v2623_v60, %v2339_v59  ;;  %v2195_v11 = vld [vmem:[%s3792_s1 + $0x368] sm:$0xf] }
  0x74   :  { %1271 = vmatpush.bf16.msra.mxu2 %v2112_v58  ;;  %v2551_v58 = vld [vmem:[%s3792_s1 + $0x250] sm:$0xf0]  ;;  %v2614_v4 = vld [vmem:[%s3792_s1 + $0x448] sm:$0xf0]  ;;  %v2183_v15 = vld [vmem:[%s3792_s1 + $0x350] sm:$0xf] }
  0x75   :  { %1234 = vmatpush.bf16.msrb.mxu1 %v1800_v62  ;;  %v2316_v62 = vor.u32 %v2617_v50, %v2315_v49  ;;  %v2304_v10 = vor.u32 %v2614_v4, %v2303_v2  ;;  %v2587_v12 = vld [vmem:[%s3792_s1 + $0x370] sm:$0xf0]  ;;  %v2584_v16 = vld [vmem:[%s3792_s1 + $0x358] sm:$0xf0]  ;;  %v2279_v17 = vld [vmem:[%s3792_s1 + $0x410] sm:$0xf] }
  0x76   :  { %1247 = vmatpush.bf16.msrb.mxu3 %v1896_v0  ;;  %1259 = vmatpush.bf16.msra.mxu0 %v2004_v6  ;;  %v2207_v0 = vld [vmem:[%s3792_s1 + $0x380] sm:$0xf]  ;;  %v2052_v6 = vor.u32 %v2551_v58, %v2051_v57  ;;  %v2608_v18 = vld [vmem:[%s3792_s1 + $0x418] sm:$0xf0]  ;;  %v2267_v22 = vld [vmem:[%s3792_s1 + $0x3f8] sm:$0xf] }
  0x77   :  { %v2280_v20 = vor.u32 %v2608_v18, %v2279_v17  ;;  %v2255_v27 = vld [vmem:[%s3792_s1 + $0x3e0] sm:$0xf]  ;;  %v2602_v28 = vld [vmem:[%s3792_s1 + $0x3e8] sm:$0xf0]  ;;  %v2147_v32 = vld [vmem:[%s3792_s1 + $0x308] sm:$0xf] }
  0x78   :  { %1272 = vmatpush.bf16.msra.mxu2 %v2100_v9  ;;  %v2208_v9 = vor.u32 %v2590_v1, %v2207_v0  ;;  %v2256_v30 = vor.u32 %v2602_v28, %v2255_v27  ;;  %v2575_v33 = vld [vmem:[%s3792_s1 + $0x310] sm:$0xf0]  ;;  %v2243_v34 = vld [vmem:[%s3792_s1 + $0x3c8] sm:$0xf]  ;;  %v2631_v40 = vld [vmem:[%s3794_s3 + $0x38] sm:$0xff]  ;;  %s2705_s20 = smov [#allocation2]  }
  0x79   :  { %1235 = vmatpush.bf16.msrb.mxu1 %v1788_v13  ;;  %v2196_v13 = vor.u32 %v2587_v12, %v2195_v11  ;;  %v2599_v35 = vld [vmem:[%s3792_s1 + $0x3d0] sm:$0xf0]  ;;  %v2628_v49 = vld [vmem:[%s3794_s3 + $0x20] sm:$0xff]  ;;  %v2627_v52 = vld [vmem:[%s3794_s3 + $0x18] sm:$0xff]  ;;  %s1742_s21 = sshll.u32 %s2705_s20, 4  ;;  %s1743_s21 = int_to_ptr.vmem [resolvable:$true] %s1742_s21 }
  0x7a   :  { %1248 = vmatpush.bf16.msrb.mxu3 %v1884_v14  ;;  %1260 = vmatpush.bf16.msra.mxu0 %v1992_v19  ;;  %v2184_v19 = vor.u32 %v2584_v16, %v2183_v15  ;;  %v2244_v38 = vor.u32 %v2599_v35, %v2243_v34  ;;  %v2626_v55 = vld [vmem:[%s3794_s3 + $0x10] sm:$0xff]  ;;  %v2625_v59 = vld [vmem:[%s3794_s3 + $0x8] sm:$0xff]  ;;  %v2624_v60 = vld [vmem:[%s3794_s3] sm:$0xff] }
  0x7b   :  { %v2639_v11 = vld [vmem:[%s3794_s3 + $0x78] sm:$0xff]  ;;  %v2637_v16 = vld [vmem:[%s3794_s3 + $0x68] sm:$0xff] }
  0x7c   :  { %1273 = vmatpush.bf16.msra.mxu2 %v2088_v21  ;;  %v2581_v21 = vld [vmem:[%s3792_s1 + $0x340] sm:$0xf0] }
  0x7d   :  { %1236 = vmatpush.bf16.msrb.mxu1 %v1776_v25  ;;  %v2159_v25 = vld [vmem:[%s3792_s1 + $0x320] sm:$0xf] }
  0x7e   :  { %1249 = vmatpush.bf16.msrb.mxu3 %v1872_v26  ;;  %1261 = vmatpush.bf16.msra.mxu0 %v1980_v37  ;;  %v2578_v26 = vld [vmem:[%s3792_s1 + $0x328] sm:$0xf0]  ;;  %v2148_v37 = vor.u32 %v2575_v33, %v2147_v32  ;;  %v2634_v33 = vld [vmem:[%s3794_s3 + $0x50] sm:$0xff] }
  0x7f   :  { %v2160_v29 = vor.u32 %v2578_v26, %v2159_v25  ;;  %v2635_v26 = vld [vmem:[%s3794_s3 + $0x58] sm:$0xff] }
  0x80   :  { %1274 = vmatpush.bf16.msra.mxu2 %v2076_v39 }
  0x81   :  { %1237 = vmatpush.bf16.msrb.mxu1 %v1764_v43  ;;  %v2630_v43 = vld [vmem:[%s3794_s3 + $0x30] sm:$0xff] }
  0x82   :  { %1250 = vmatpush.bf16.msrb.mxu3 %v1860_v44  ;;  %1262 = vmatpush.bf16.msra.mxu0 %v1968_v51 }
  0x84   :  { %1275 = vmatpush.bf16.msra.mxu2 %v2064_v54  ;;  %1238 = vmatmul.bf16.vlgmr.msrb.gmra.mxu1 %v3008_v3  ;;  %v2611_v3 = vld [vmem:[%s3792_s1 + $0x430] sm:$0xf0] }
  0x85   :  { %1282 = vmatpush.bf16.msra.mxu1 %v2232_v45  ;;  %1251 = vmatmul.bf16.vlgmr.msrb.gmra.mxu3 %v3016_v7  ;;  %v2291_v7 = vld [vmem:[%s3792_s1 + $0x428] sm:$0xf] }
  0x86   :  { %1295 = vmatpush.bf16.msra.mxu3 %v2328_v46  ;;  %1263 = vmatpush.bf16.msra.mxu0 %v1956_v5  ;;  %v2292_v14 = vor.u32 %v2611_v3, %v2291_v7  ;;  %v2629_v45 = vld [vmem:[%s3794_s3 + $0x28] sm:$0xff] }
  0x88   :  { %1276 = vmatpush.bf16.msra.mxu2 %v2052_v6 }
  0x89   :  { %1283 = vmatpush.bf16.msra.mxu1 %v2220_v61  ;;  %1264 = vmatmul.bf16.vlgmr.msra.gmra.mxu0 %v2997_v63  ;;  %v2171_v63 = vld [vmem:[%s3792_s1 + $0x338] sm:$0xf] }
  0x8a   :  { %1296 = vmatpush.bf16.msra.mxu3 %v2316_v62  ;;  %1315 = vmatpush.bf16.msrb.mxu0 %v2340_v8  ;;  %v2172_v23 = vor.u32 %v2581_v21, %v2171_v63 }
  0x8b   :  { %1277 = vmatmul.bf16.vlgmr.msra.gmra.mxu2 %v2986_v53  ;;  %v2605_v53 = vld [vmem:[%s3792_s1 + $0x400] sm:$0xf0] }
  0x8c   :  { %v2268_v24 = vor.u32 %v2605_v53, %v2267_v22  ;;  %1577 = vmatpush.bf16.msrb.mxu2 %v2631_v40 }
  0x8d   :  { %1284 = vmatpush.bf16.msra.mxu1 %v2208_v9 }
  0x8e   :  { %1297 = vmatpush.bf16.msra.mxu3 %v2304_v10  ;;  %1590 = vmatpush.bf16.msra.mxu0 %v2639_v11 }
  0x90   :  { %1578 = vmatpush.bf16.msrb.mxu2 %v2630_v43 }
  0x91   :  { %1285 = vmatpush.bf16.msra.mxu1 %v2196_v13  ;;  %v2638_v13 = vld [vmem:[%s3794_s3 + $0x70] sm:$0xff] }
  0x92   :  { %1298 = vmatpush.bf16.msra.mxu3 %v2292_v14  ;;  %1591 = vmatpush.bf16.msra.mxu0 %v2638_v13 }
  0x94   :  { %1579 = vmatpush.bf16.msrb.mxu2 %v2629_v45 }
  0x95   :  { %1286 = vmatpush.bf16.msra.mxu1 %v2184_v19 }
  0x96   :  { %1299 = vmatpush.bf16.msra.mxu3 %v2280_v20  ;;  %1592 = vmatpush.bf16.msra.mxu0 %v2637_v16  ;;  %v2636_v20 = vld [vmem:[%s3794_s3 + $0x60] sm:$0xff] }
  0x98   :  { %1580 = vmatpush.bf16.msrb.mxu2 %v2628_v49 }
  0x99   :  { %1287 = vmatpush.bf16.msra.mxu1 %v2172_v23  ;;  %2343 = vmatmul.msk.bf16.vlgmr.msrb.gmra.mxu0 %vm1044_vm0, %v3115_v56  ;;  %v3687_v56 = vld [vmem:[%s3793_s2] sm:$0x7] }
  0x9a   :  { %1300 = vmatpush.bf16.msra.mxu3 %v2268_v24  ;;  %v230_v44 = vperm.slane %v3687_v56, 0  ;;  %v231_v14 = vperm.slane %v3687_v56, 1  ;;  %1593 = vmatpush.bf16.msra.mxu0 %v2636_v20  ;;  %v232_v11 = vperm.slane %v3687_v56, 2  ;;  %v2642_v56 = vld [vmem:[%s3794_s3 + $0x90] sm:$0xff] }
  0x9c   :  { %1581 = vmatpush.bf16.msrb.mxu2 %v2627_v52  ;;  %v2647_v52 = vld [vmem:[%s3794_s3 + $0xb8] sm:$0xff] }
  0x9d   :  { %1288 = vmatpush.bf16.msra.mxu1 %v2160_v29 }
  0x9e   :  { %1301 = vmatpush.bf16.msra.mxu3 %v2256_v30  ;;  %1594 = vmatpush.bf16.msra.mxu0 %v2635_v26 }
  0xa0   :  { %v1057_v39 = vpop.f32.mrf.mxu0  ;;  %1582 = vmatpush.bf16.msrb.mxu2 %v2626_v55 }
  0xa1   :  { %1289 = vmatpush.bf16.msra.mxu1 %v2148_v37  ;;  %v1058_v47 = vadd.f32 %v1057_v39, %v230_v44 }
  0xa2   :  { %1302 = vmatpush.bf16.msra.mxu3 %v2244_v38  ;;  %1595 = vmatpush.bf16.msra.mxu0 %v2634_v33  ;;  %v2633_v38 = vld [vmem:[%s3794_s3 + $0x48] sm:$0xff] }
  0xa3   :  { %v1070_v41 = vpop.f32.mrf.mxu1 }
  0xa4   :  { %1290 = vmatmul.bf16.vlgmr.msra.gmra.mxu1 %v3185_v31  ;;  %v1071_v51 = vadd.f32 %v1070_v41, %v1058_v47  ;;  %1583 = vmatpush.bf16.msrb.mxu2 %v2625_v59 }
  0xa5   :  { %1303 = vmatmul.bf16.vlgmr.msra.gmra.mxu3 %v3196_v36  ;;  %1603 = vmatpush.bf16.msrb.mxu1 %v2647_v52  ;;  %v2649_v52 = vld [vmem:[%s3796_s5 + $0x8] sm:$0xff] }
  0xa6   :  { %1596 = vmatpush.bf16.msra.mxu0 %v2633_v38 }
  0xa8   :  { %v1096_v42 = vpop.f32.mrf.mxu3  ;;  %v1059_v36 = vpop.f32.mrf.mxu0  ;;  %1584 = vmatpush.bf16.msrb.mxu2 %v2624_v60 }
  0xaa   :  { %v1083_v31 = vpop.f32.mrf.mxu2 }
  0xab   :  { %v1072_v46 = vpop.f32.mrf.mxu1  ;;  %v1084_v54 = vadd.f32 %v1083_v31, %v1071_v51 }
  0xad   :  { %v1097_v58 = vadd.f32 %v1096_v42, %v1084_v54  ;;  %v2632_v42 = vld [vmem:[%s3794_s3 + $0x40] sm:$0xff] }
  0xae   :  { %1597 = vmatpush.bf16.msra.mxu0 %v2632_v42 }
  0xb0   :  { %v1098_v48 = vpop.f32.mrf.mxu3 }
  0xb2   :  { %v1085_v50 = vpop.f32.mrf.mxu2 }
  0xba   :  { %v1135_v57 = vpop.f32.mrf.mxu2 }
  0xc0   :  { %v1109_v61 = vpop.f32.mrf.mxu0 }
  0xc1   :  { %v1110_v62 = vadd.f32 %v1109_v61, %v1097_v58  ;;  %v2646_v61 = vld [vmem:[%s3794_s3 + $0xb0] sm:$0xff] }
  0xc2   :  { %v1137_v2 = vpop.f32.mrf.mxu2  ;;  %1604 = vmatpush.bf16.msrb.mxu1 %v2646_v61 }
  0xc3   :  { %v1122_v0 = vpop.f32.mrf.mxu1 }
  0xc4   :  { %v1123_v1 = vadd.f32 %v1122_v0, %v1110_v62 }
  0xc6   :  { %v1136_v4 = vadd.f32 %v1135_v57, %v1123_v1 }
  0xc8   :  { %v2344_v5 = vmul.f32 -1.442695, %v1136_v4  ;;  %v1148_v6 = vpop.f32.mrf.mxu3  ;;  %v1111_v8 = vpop.f32.mrf.mxu0 }
  0xc9   :  { %v1149_v18 = vadd.f32 %v1148_v6, %v231_v14 }
  0xca   :  { %2659 = vpow2.f32 %v2344_v5  ;;  %v2645_v5 = vld [vmem:[%s3794_s3 + $0xa8] sm:$0xff] }
  0xcb   :  { %v1124_v9 = vpop.f32.mrf.mxu1  ;;  %1605 = vmatpush.bf16.msrb.mxu1 %v2645_v5 }
  0xce   :  { %v1161_v10 = vpop.f32.mrf.mxu2 }
  0xcf   :  { %v1162_v21 = vadd.f32 %v1161_v10, %v1149_v18 }
  0xd0   :  { %v2660_v12 = vpop.eup %2659  ;;  %v1150_v7 = vpop.f32.mrf.mxu3 }
  0xd1   :  { %v1330_v3 = vadd.f32 1.0, %v2660_v12 }
  0xd3   :  { %2661 = vrcp.f32 %v1330_v3  ;;  %v1344_v22 = vand.u32 2147483648, %v1330_v3  ;;  %v1342_v24 = vand.u32 2147483647, %v1330_v3  ;;  %vm1338_vm2 = vweird.f32 %v1330_v3 }
  0xd5   :  { %v1345_v29 = vor.u32 1.1754944e-38, %v1344_v22  ;;  %vm1343_vm4 = vcmp.eq.f32.partialorder %v1342_v24, 8.507059e+37 }
  0xd6   :  { %v1163_v15 = vpop.f32.mrf.mxu2 }
  0xd7   :  { %v2643_v15 = vld [vmem:[%s3794_s3 + $0x98] sm:$0xff] }
  0xd9   :  { %v2662_v17 = vpop.eup %2661 }
  0xda   :  { %v1334_v19 = vmul.f32 %v2662_v17, %v1330_v3  ;;  %vm1339_vm1 = vweird.f32 %v2662_v17  ;;  %v2644_v3 = vld [vmem:[%s3794_s3 + $0xa0] sm:$0xff] }
  0xdb   :  { %vm1340_vm3 = vmor %vm1338_vm2, %vm1339_vm1  ;;  %1606 = vmatpush.bf16.msrb.mxu1 %v2644_v3 }
  0xdc   :  { %v1335_v63 = vsub.f32 1.0, %v1334_v19  ;;  %v2641_v19 = vld [vmem:[%s3794_s3 + $0x88] sm:$0xff] }
  0xde   :  { %v1336_v23 = vmul.f32 %v2662_v17, %v1335_v63 }
  0xdf   :  { %1607 = vmatpush.bf16.msrb.mxu1 %v2643_v15 }
  0xe0   :  { %v1174_v53 = vpop.f32.mrf.mxu0  ;;  %v1337_v27 = vadd.f32 %v2662_v17, %v1336_v23 }
  0xe1   :  { %v1187_v25 = vpop.f32.mrf.mxu1  ;;  %v1175_v28 = vadd.f32 %v1174_v53, %v1162_v21  ;;  %v2640_v21 = vld [vmem:[%s3794_s3 + $0x80] sm:$0xff] }
  0xe2   :  { %v1341_v30 = vsel %vm1340_vm3, %v2662_v17, %v1337_v27 }
  0xe3   :  { %v1346_v32 = vsel %vm1343_vm4, %v1345_v29, %v1341_v30  ;;  %v1188_v35 = vadd.f32 %v1187_v25, %v1175_v28  ;;  %1608 = vmatpush.bf16.msrb.mxu1 %v2642_v56 }
  0xe4   :  { %v1378_v34 = vpack.c.bf16 %v1346_v32, %v1346_v32 }
  0xe6   :  { %1585 = vmatmul.bf16.vlgmr.msrb.gmra.mxu2 %v1378_v34 }
  0xe7   :  { %1609 = vmatpush.bf16.msrb.mxu1 %v2641_v19 }
  0xe8   :  { %v1200_v37 = vpop.f32.mrf.mxu3  ;;  %v1176_v39 = vpop.f32.mrf.mxu0 }
  0xe9   :  { %v1189_v40 = vpop.f32.mrf.mxu1  ;;  %v1201_v41 = vadd.f32 %v1200_v37, %v1188_v35 }
  0xeb   :  { %1610 = vmatpush.bf16.msrb.mxu1 %v2640_v21 }
  0xee   :  { %v1213_v43 = vpop.f32.mrf.mxu2 }
  0xef   :  { %v1214_v31 = vadd.f32 %v1213_v43, %v1201_v41 }
  0xf0   :  { %v1202_v36 = vpop.f32.mrf.mxu3  ;;  %v1226_v44 = vpop.f32.mrf.mxu0 }
  0xf1   :  { %v1227_v45 = vadd.f32 %v1226_v44, %v1214_v31 }
  0xf3   :  { %v2345_v46 = vmul.f32 -1.442695, %v1227_v45 }
  0xf5   :  { %2663 = vpow2.f32 %v2345_v46  ;;  %v2655_v46 = vld [vmem:[%s3796_s5 + $0x38] sm:$0xff] }
  0xf6   :  { %v1215_v47 = vpop.f32.mrf.mxu2  ;;  %1704 = vmatpush.bf16.msrb.mxu3 %v2655_v46 }
  0xf7   :  { %v2654_v47 = vld [vmem:[%s3796_s5 + $0x30] sm:$0xff] }
  0xf8   :  { %v1228_v48 = vpop.f32.mrf.mxu0 }
  0xf9   :  { %v2653_v48 = vld [vmem:[%s3796_s5 + $0x28] sm:$0xff] }
  0xfa   :  { %1705 = vmatpush.bf16.msrb.mxu3 %v2654_v47 }
  0xfb   :  { %v2664_v49 = vpop.eup %2663 }
  0xfc   :  { %v1331_v50 = vadd.f32 1.0, %v2664_v49  ;;  %v2652_v49 = vld [vmem:[%s3796_s5 + $0x20] sm:$0xff] }
  0xfe   :  { %2665 = vrcp.f32 %v1331_v50  ;;  %v1359_v62 = vand.u32 2147483648, %v1331_v50  ;;  %v1357_v1 = vand.u32 2147483647, %v1331_v50  ;;  %vm1353_vm6 = vweird.f32 %v1331_v50  ;;  %1706 = vmatpush.bf16.msrb.mxu3 %v2653_v48 }
 0x100   :  { %v1360_v8 = vor.u32 1.1754944e-38, %v1359_v62  ;;  %vm1358_vm8 = vcmp.eq.f32.partialorder %v1357_v1, 8.507059e+37 }
 0x101   :  { %v1239_v51 = vpop.f32.mrf.mxu1 }
 0x102   :  { %v1240_v13 = vadd.f32 %v1239_v51, %v232_v11  ;;  %1707 = vmatpush.bf16.msrb.mxu3 %v2652_v49  ;;  %v2650_v51 = vld [vmem:[%s3796_s5 + $0x10] sm:$0xff] }
 0x104   :  { %v2666_v54 = vpop.eup %2665 }
 0x105   :  { %v1349_v57 = vmul.f32 %v2666_v54, %v1331_v50  ;;  %vm1354_vm5 = vweird.f32 %v2666_v54  ;;  %v2651_v50 = vld [vmem:[%s3796_s5 + $0x18] sm:$0xff] }
 0x106   :  { %v1265_v58 = vpop.f32.mrf.mxu0  ;;  %vm1355_vm7 = vmor %vm1353_vm6, %vm1354_vm5  ;;  %1708 = vmatpush.bf16.msrb.mxu3 %v2651_v50 }
 0x107   :  { %v1350_v60 = vsub.f32 1.0, %v1349_v57 }
 0x108   :  { %v1252_v55 = vpop.f32.mrf.mxu3 }
 0x109   :  { %v1241_v59 = vpop.f32.mrf.mxu1  ;;  %v1351_v0 = vmul.f32 %v2666_v54, %v1350_v60  ;;  %v1253_v17 = vadd.f32 %v1252_v55, %v1240_v13  ;;  %v2648_v55 = vld [vmem:[%s3796_s5] sm:$0xff] }
 0x10a   :  { %1709 = vmatpush.bf16.msrb.mxu3 %v2650_v51  ;;  %v2658_v13 = vld [vmem:[%s3797_s6] ss:$0 sm:$0xff]  ;;  %s1744_s6 = sshll.u32 %s3798_s7, 4  ;;  %s1745_s6 = int_to_ptr.hbm [resolvable:$true] %s1744_s6 }
 0x10b   :  { %v1352_v2 = vadd.f32 %v2666_v54, %v1351_v0  ;;  %v1266_v18 = vadd.f32 %v1265_v58, %v1253_v17 }
 0x10d   :  { %v1356_v9 = vsel %vm1355_vm7, %v2666_v54, %v1352_v2  ;;  %v2657_v54 = vld [vmem:[%s3795_s4] ss:$0 sm:$0xff] }
 0x10e   :  { %v1278_v4 = vpop.f32.mrf.mxu2  ;;  %v1267_v10 = vpop.f32.mrf.mxu0  ;;  %v1361_v12 = vsel %vm1358_vm8, %v1360_v8, %v1356_v9  ;;  %1710 = vmatpush.bf16.msrb.mxu3 %v2649_v52 }
 0x10f   :  { %v1379_v7 = vpack.c.bf16 %v1361_v12, %v1361_v12  ;;  %v1279_v22 = vadd.f32 %v1278_v4, %v1266_v18 }
 0x110   :  { %v1254_v6 = vpop.f32.mrf.mxu3 }
 0x111   :  { %1598 = vmatmul.bf16.vlgmr.msra.gmra.mxu0 %v1379_v7 }
 0x112   :  { %1711 = vmatpush.bf16.msrb.mxu3 %v2648_v55 }
 0x116   :  { %v1280_v14 = vpop.f32.mrf.mxu2  ;;  %v1317_v16 = vpop.f32.mrf.mxu0 }
 0x11e   :  { %v1319_v63 = vpop.f32.mrf.mxu0 }
 0x121   :  { %v1291_v20 = vpop.f32.mrf.mxu1 }
 0x122   :  { %v1292_v53 = vadd.f32 %v1291_v20, %v1279_v22 }
 0x128   :  { %v1304_v23 = vpop.f32.mrf.mxu3 }
 0x129   :  { %v1305_v24 = vadd.f32 %v1304_v23, %v1292_v53  ;;  %v1293_v25 = vpop.f32.mrf.mxu1 }
 0x12b   :  { %v1318_v26 = vadd.f32 %v1317_v16, %v1305_v24 }
 0x12d   :  { %v2346_v27 = vmul.f32 -1.442695, %v1318_v26 }
 0x12f   :  { %2667 = vpow2.f32 %v2346_v27 }
 0x130   :  { %v1306_v28 = vpop.f32.mrf.mxu3 }
 0x135   :  { %v2668_v29 = vpop.eup %2667 }
 0x136   :  { %v1332_v30 = vadd.f32 1.0, %v2668_v29 }
 0x138   :  { %2669 = vrcp.f32 %v1332_v30  ;;  %v1374_v35 = vand.u32 2147483648, %v1332_v30  ;;  %v1372_v38 = vand.u32 2147483647, %v1332_v30  ;;  %vm1368_vm10 = vweird.f32 %v1332_v30 }
 0x13a   :  { %v1375_v40 = vor.u32 1.1754944e-38, %v1374_v35  ;;  %vm1373_vm12 = vcmp.eq.f32.partialorder %v1372_v38, 8.507059e+37 }
 0x13e   :  { %v2670_v32 = vpop.eup %2669 }
 0x13f   :  { %v1364_v33 = vmul.f32 %v2670_v32, %v1332_v30  ;;  %vm1369_vm9 = vweird.f32 %v2670_v32 }
 0x140   :  { %vm1370_vm11 = vmor %vm1368_vm10, %vm1369_vm9 }
 0x141   :  { %v1365_v34 = vsub.f32 1.0, %v1364_v33 }
 0x143   :  { %v1366_v37 = vmul.f32 %v2670_v32, %v1365_v34 }
 0x145   :  { %v1367_v39 = vadd.f32 %v2670_v32, %v1366_v37 }
 0x147   :  { %v1371_v41 = vsel %vm1370_vm11, %v2670_v32, %v1367_v39 }
 0x148   :  { %v1376_v42 = vsel %vm1373_vm12, %v1375_v40, %v1371_v41 }
 0x149   :  { %v1380_v43 = vpack.c.bf16 %v1376_v42, %v1376_v42 }
 0x14b   :  { %1611 = vmatmul.bf16.vlgmr.msrb.gmra.mxu1 %v1380_v43 }
 0x169   :  { %v1586_v31 = vpop.f32.mrf.mxu2 }
 0x16a   :  { %v1587_v57 = vadd.f32 %v2657_v54, %v1586_v31 }
 0x171   :  { %v1588_v36 = vpop.f32.mrf.mxu2 }
 0x18e   :  { %v1599_v44 = vpop.f32.mrf.mxu0 }
 0x18f   :  { %v1600_v58 = vadd.f32 %v1599_v44, %v1587_v57 }
 0x196   :  { %v1601_v45 = vpop.f32.mrf.mxu0 }
 0x1c8   :  { %v1612_v59 = vpop.f32.mrf.mxu1 }
 0x1c9   :  { %v1613_v60 = vadd.f32 %v1612_v59, %v1600_v58 }
 0x1cb   :  { %v2443_v61 = vmul.f32 -1.442695, %v1613_v60 }
 0x1cd   :  { %2671 = vpow2.f32 %v2443_v61 }
 0x1d0   :  { %v1614_v62 = vpop.f32.mrf.mxu1 }
 0x1d3   :  { %v2672_v0 = vpop.eup %2671 }
 0x1d4   :  { %v1619_v1 = vadd.f32 1.0, %v2672_v0 }
 0x1d6   :  { %2673 = vrcp.f32 %v1619_v1  ;;  %v1631_v6 = vand.u32 2147483648, %v1619_v1  ;;  %v1629_v9 = vand.u32 2147483647, %v1619_v1  ;;  %vm1625_vm14 = vweird.f32 %v1619_v1 }
 0x1d8   :  { %v1632_v11 = vor.u32 1.1754944e-38, %v1631_v6  ;;  %vm1630_vm0 = vcmp.eq.f32.partialorder %v1629_v9, 8.507059e+37 }
 0x1dc   :  { %v2674_v2 = vpop.eup %2673 }
 0x1dd   :  { %v1621_v4 = vmul.f32 %v2674_v2, %v1619_v1  ;;  %vm1626_vm13 = vweird.f32 %v2674_v2 }
 0x1de   :  { %vm1627_vm15 = vmor %vm1625_vm14, %vm1626_vm13 }
 0x1df   :  { %v1622_v5 = vsub.f32 1.0, %v1621_v4 }
 0x1e1   :  { %v1623_v8 = vmul.f32 %v2674_v2, %v1622_v5 }
 0x1e3   :  { %v1624_v10 = vadd.f32 %v2674_v2, %v1623_v8 }
 0x1e5   :  { %v1628_v12 = vsel %vm1627_vm15, %v2674_v2, %v1624_v10 }
 0x1e6   :  { %v1633_v7 = vsel %vm1630_vm0, %v1632_v11, %v1628_v12 }
 0x1e7   :  { %v1635_v3 = vpack.c.bf16 %v1633_v7, %v1633_v7 }
 0x1e9   :  { %1712 = vmatmul.bf16.vlgmr.msrb.gmra.mxu3 %v1635_v3 }
 0x26c   :  { %v1713_v14 = vpop.f32.mrf.mxu3 }
 0x26d   :  { %v1714_v15 = vadd.f32 %v2658_v13, %v1713_v14 }
 0x26f   :  { %v2476_v16 = vmul.f32 -1.442695, %v1714_v15 }
 0x271   :  { %2675 = vpow2.f32 %v2476_v16 }
 0x274   :  { %v1715_v17 = vpop.f32.mrf.mxu3 }
 0x277   :  { %v2676_v56 = vpop.eup %2675 }
 0x278   :  { %v1720_v18 = vadd.f32 1.0, %v2676_v56 }
 0x27a   :  { %2677 = vrcp.f32 %v1720_v18  ;;  %v1732_v21 = vand.u32 2147483648, %v1720_v18  ;;  %v1730_v53 = vand.u32 2147483647, %v1720_v18  ;;  %vm1726_vm2 = vweird.f32 %v1720_v18 }
 0x27c   :  { %v1733_v24 = vor.u32 1.1754944e-38, %v1732_v21  ;;  %vm1731_vm4 = vcmp.eq.f32.partialorder %v1730_v53, 8.507059e+37 }
 0x280   :  { %v2678_v19 = vpop.eup %2677 }
 0x281   :  { %v1722_v20 = vmul.f32 %v2678_v19, %v1720_v18  ;;  %vm1727_vm1 = vweird.f32 %v2678_v19 }
 0x282   :  { %vm1728_vm3 = vmor %vm1726_vm2, %vm1727_vm1 }
 0x283   :  { %v1723_v63 = vsub.f32 1.0, %v1722_v20 }
 0x285   :  { %v1724_v22 = vmul.f32 %v2678_v19, %v1723_v63 }
 0x287   :  { %v1725_v23 = vadd.f32 %v2678_v19, %v1724_v22 }
 0x289   :  { %v1729_v25 = vsel %vm1728_vm3, %v2678_v19, %v1725_v23 }
 0x28a   :  { %v1734_v26 = vsel %vm1731_vm4, %v1733_v24, %v1729_v25 }
 0x28b   :  { %1736 = vst [vmem:[#allocation2] sm:$0xff] %v1734_v26 }
 0x28c   :  { %1747 = dma.vmem_to_hbm [thread:$0]  %s1743_s21, 128, %s1745_s6, [#allocation3]  }
 0x28d   :  { %2703 = dma.done.wait [#allocation3], 128  }
 0x28e   :  { %2704 = vsyncadd [#allocation3], 4294967168 }
 0x28f   :  { %1752 = vsyncpa [#allocation3], 1 }

</bundles_post_ra>
